<compile_context>
chip_gen: v7x
topology: tpu7x:2x2x1
jax: 0.10.0
libtpu: 0.0.40
codegen_flags: <defaults>
</compile_context>

<pallas_src>
import functools

import jax
import jax.numpy as jnp
from jax.experimental import pallas as pl
from jax.experimental.pallas import tpu as pltpu

CODE_DIM = 128   # shape / appearance latent code dim
HIDDEN = 128     # decoder MLP width
C1 = 32          # encoder conv channels
POS_DIM = 3
VIEW_DIM = 3
PV_DIM = 8       # packed [pos(3) | view_dir(3) | pad(2)]

VMEM_LIMIT = 48 * 1024 * 1024  # <= v7x 64 MiB physical; bigger tiles on v5e/v6e


def _round_up(x, m):
    return ((x + m - 1) // m) * m


# ---------------------------------------------------------------------------
# Encoder kernel: lane-dense conv-as-matmul + ReLU, GAP partial sums in a
# VMEM scratch (init via pl.when on the first HW tile), pooled sum emitted on
# the last tile.  Code heads are done in plain JAX afterwards.
# ---------------------------------------------------------------------------
def encoder_kernel(patches_ref, wcT_ref, bc_ref, pooled_ref, acc_ref,
                   *, hw_valid, apply_mask):
    f32 = jnp.float32
    hw = pl.program_id(1)

    @pl.when(hw == 0)
    def _init():
        acc_ref[...] = jnp.zeros_like(acc_ref)

    # (C1, K) @ (K, THW) -> (C1, THW); lane axis = spatial positions.
    feat = (jnp.dot(wcT_ref[...], patches_ref[...], preferred_element_type=f32)
            + bc_ref[...])
    feat = jnp.maximum(feat, 0.0)

    if apply_mask:
        thw = feat.shape[1]
        pos = jax.lax.broadcasted_iota(jnp.int32, feat.shape, 1) + hw * thw
        feat = jnp.where(pos < hw_valid, feat, 0.0)

    # GAP partial sum: lane reduction -> XLU slot (MXU stays free).
    acc_ref[...] += jnp.sum(feat, axis=1, keepdims=True)

    @pl.when(hw == pl.num_programs(1) - 1)
    def _finalize():
        pooled_ref[...] = acc_ref[...]


# ---------------------------------------------------------------------------
# Fused shape-decoder + color-decoder kernel, transposed dataflow:
# points on the lane axis, activations shaped (HIDDEN, TR), lane-dense store.
# ---------------------------------------------------------------------------
def decoder_kernel(pv_ref, bias_ref, w8_ref, wh_ref, bh_ref,
                   whead_ref, bhead_ref, out_ref):
    f32 = jnp.float32
    bf16 = jnp.bfloat16

    pv = pv_ref[...]                      # (PV_DIM, TR) bf16 [pos | view | pad]
    sb = bias_ref[0]                      # (HIDDEN, 1) f32: shape_code @ s_w0c + s_b0
    cb = bias_ref[1]                      # (HIDDEN, 1) f32: appear_code @ c_w0a + c_b0

    # Fused first layer of BOTH decoders: one (2*HIDDEN, 8) @ (8, TR) push.
    pv01 = jnp.dot(w8_ref[...], pv, preferred_element_type=f32)   # (2*HIDDEN, TR)

    # Shape decoder.
    h0 = jnp.maximum(pv01[:HIDDEN, :] + sb, 0.0)
    h = jnp.maximum(
        jnp.dot(wh_ref[0], h0.astype(bf16), preferred_element_type=f32) + bh_ref[0],
        0.0)                              # intermediate_output  (HIDDEN, TR)

    # Color decoder (pv contribution already in pv01[HIDDEN:]).
    g0 = jnp.maximum(
        jnp.dot(wh_ref[1], h.astype(bf16), preferred_element_type=f32)
        + pv01[HIDDEN:, :] + cb, 0.0)
    g = jnp.maximum(
        jnp.dot(wh_ref[2], g0.astype(bf16), preferred_element_type=f32) + bh_ref[1],
        0.0)                              # (HIDDEN, TR)

    # Heads: two padded (4, HIDDEN) dots summed (no concat copy); row 0 = sigma
    # (raw), rows 1..3 = rgb (sigmoid).  Lane-dense (4, TR) store.
    out_pre = (jnp.dot(whead_ref[0], h.astype(bf16), preferred_element_type=f32)
               + jnp.dot(whead_ref[1], g.astype(bf16), preferred_element_type=f32)
               + bhead_ref[...])          # (4, TR)
    row = jax.lax.broadcasted_iota(jnp.int32, out_pre.shape, 0)
    out_ref[...] = jnp.where(row == 0, out_pre, jax.nn.sigmoid(out_pre))


# ---------------------------------------------------------------------------
# Glue
# ---------------------------------------------------------------------------
def im2col_3x3_lane_dense(img):
    """img [B, C, H, W] -> patches [B, C*9, H*W] (3x3, stride 1, SAME pad).

    Lane (last) axis = spatial positions (128-multiple tiles after padding)."""
    B, C, H, W = img.shape
    xp = jnp.pad(img, ((0, 0), (0, 0), (1, 1), (1, 1)))
    cols = [xp[:, :, dy:dy + H, dx:dx + W] for dy in range(3) for dx in range(3)]
    patches = jnp.stack(cols, axis=2)              # [B, C, 9, H, W]
    return patches.reshape(B, C * 9, H * W)


def init_params(key, cin=3):
    ks = jax.random.split(key, 12)

    def w(k, shape, scale):
        return (scale * jax.random.normal(k, shape)).astype(jnp.float32)

    z = lambda shape: jnp.zeros(shape, jnp.float32)
    p = {}
    # encoder
    p["wc"] = w(ks[0], (cin * 9, C1), 0.1)
    p["bc"] = z((1, C1))
    p["wcode"] = w(ks[1], (C1, 2 * CODE_DIM), 0.1)
    p["bcode"] = z((1, 2 * CODE_DIM))
    # shape decoder
    p["s_w0c"] = w(ks[2], (CODE_DIM, HIDDEN), 0.05)
    p["s_w0p"] = w(ks[3], (POS_DIM, HIDDEN), 0.05)
    p["s_b0"] = z((1, HIDDEN))
    p["s_w1"] = w(ks[4], (HIDDEN, HIDDEN), 0.05)
    p["s_b1"] = z((1, HIDDEN))
    p["s_wsig"] = w(ks[5], (HIDDEN, 1), 0.05)
    p["s_bsig"] = z((1, 1))
    # color decoder
    p["c_w0a"] = w(ks[6], (CODE_DIM, HIDDEN), 0.05)
    p["c_w0h"] = w(ks[7], (HIDDEN, HIDDEN), 0.05)
    p["c_w0p"] = w(ks[8], (POS_DIM, HIDDEN), 0.05)
    p["c_w0v"] = w(ks[9], (VIEW_DIM, HIDDEN), 0.05)
    p["c_b0"] = z((1, HIDDEN))
    p["c_w1"] = w(ks[10], (HIDDEN, HIDDEN), 0.05)
    p["c_b1"] = z((1, HIDDEN))
    p["c_wrgb"] = w(ks[11], (HIDDEN, 3), 0.05)
    p["c_brgb"] = z((1, 3))
    return p


def autorf_forward(params, img, pos_emb, view_dir):
    f32 = jnp.float32
    bf16 = jnp.bfloat16
    B, Cin, H, W = img.shape
    Np = pos_emb.shape[1]
    HW = H * W
    K = Cin * 9
    assert params["wc"].shape[0] == K, (
        f"encoder weight expects Cin={params['wc'].shape[0] // 9}, got Cin={Cin}")

    # --- Encoder: conv3x3 + ReLU + GAP (Pallas, lane-dense, bf16 stream) ---
    patches = im2col_3x3_lane_dense(img.astype(f32))            # [B, K, HW]
    THW = min(2048, _round_up(HW, 128))
    HW_pad = _round_up(HW, THW)
    if HW_pad != HW:
        patches = jnp.pad(patches, ((0, 0), (0, 0), (0, HW_pad - HW)))
    patches = patches.astype(bf16)

    wcT = params["wc"].T.astype(bf16)                           # (C1, K)
    bc = params["bc"].T                                         # (C1, 1)

    enc_w_spec = lambda shape: pl.BlockSpec(shape, lambda b, h: tuple(0 for _ in shape))

    pooled_sum = pl.pallas_call(
        functools.partial(encoder_kernel, hw_valid=HW, apply_mask=(HW_pad != HW)),
        out_shape=jax.ShapeDtypeStruct((B, C1, 1), f32),
        grid=(B, HW_pad // THW),
        in_specs=[
            pl.BlockSpec((None, K, THW), lambda b, h: (b, 0, h)),
            enc_w_spec((C1, K)),
            enc_w_spec((C1, 1)),
        ],
        out_specs=pl.BlockSpec((None, C1, 1), lambda b, h: (b, 0, 0)),
        scratch_shapes=[pltpu.VMEM((C1, 1), f32)],
        compiler_params=pltpu.CompilerParams(
            dimension_semantics=("parallel", "arbitrary"),
            vmem_limit_bytes=VMEM_LIMIT),
    )(patches, wcT, bc)

    # Code heads + per-batch decoder code-bias terms: tiny matmuls in JAX.
    pooled = pooled_sum[:, :, 0] / float(HW)                    # (B, C1)
    codes = pooled @ params["wcode"] + params["bcode"]          # (B, 2*CODE_DIM)
    sc, ac = codes[:, :CODE_DIM], codes[:, CODE_DIM:]
    s_bias = sc @ params["s_w0c"] + params["s_b0"]              # (B, HIDDEN)
    c_bias = ac @ params["c_w0a"] + params["c_b0"]              # (B, HIDDEN)
    code_bias = jnp.stack([s_bias, c_bias], axis=1)[:, :, :, None]  # (B, 2, H, 1)

    # --- Decoders (Pallas, transposed dataflow: points on the lane axis) ---
    TR = min(1024, _round_up(Np, 128))
    Np_pad = _round_up(Np, TR)
    pvt = jnp.concatenate(
        [pos_emb.astype(f32).transpose(0, 2, 1),
         view_dir.astype(f32).transpose(0, 2, 1),
         jnp.zeros((B, PV_DIM - POS_DIM - VIEW_DIM, Np), f32)], axis=1)  # (B, 8, Np)
    if Np_pad != Np:
        pvt = jnp.pad(pvt, ((0, 0), (0, 0), (0, Np_pad - Np)))
    pvt = pvt.astype(bf16)

    # Fused, transposed first-layer weights: rows 0:H shape path, H:2H color.
    w8T = jnp.zeros((2 * HIDDEN, PV_DIM), f32)
    w8T = w8T.at[:HIDDEN, 0:POS_DIM].set(params["s_w0p"].T)
    w8T = w8T.at[HIDDEN:, 0:POS_DIM].set(params["c_w0p"].T)
    w8T = w8T.at[HIDDEN:, POS_DIM:POS_DIM + VIEW_DIM].set(params["c_w0v"].T)
    w8T = w8T.astype(bf16)                                      # (2H, 8)

    whT = jnp.stack([params["s_w1"].T, params["c_w0h"].T,
                     params["c_w1"].T]).astype(bf16)            # (3, H, H)
    bh = jnp.stack([params["s_b1"].T, params["c_b1"].T])        # (2, H, 1) f32

    whead_s = jnp.zeros((4, HIDDEN), f32).at[0, :].set(params["s_wsig"][:, 0])
    whead_c = jnp.zeros((4, HIDDEN), f32).at[1:4, :].set(params["c_wrgb"].T)
    whead = jnp.stack([whead_s, whead_c]).astype(bf16)          # (2, 4, H)
    bhead = jnp.concatenate([params["s_bsig"], params["c_brgb"].T], axis=0)  # (4, 1)

    wgt_spec = lambda shape: pl.BlockSpec(shape, lambda b, i: tuple(0 for _ in shape))

    out_t = pl.pallas_call(
        decoder_kernel,
        out_shape=jax.ShapeDtypeStruct((B, 4, Np_pad), f32),
        grid=(B, Np_pad // TR),
        in_specs=[
            pl.BlockSpec((None, PV_DIM, TR), lambda b, i: (b, 0, i)),
            pl.BlockSpec((None, 2, HIDDEN, 1), lambda b, i: (b, 0, 0, 0)),
            wgt_spec((2 * HIDDEN, PV_DIM)),
            wgt_spec((3, HIDDEN, HIDDEN)),
            wgt_spec((2, HIDDEN, 1)),
            wgt_spec((2, 4, HIDDEN)),
            wgt_spec((4, 1)),
        ],
        out_specs=pl.BlockSpec((None, 4, TR), lambda b, i: (b, 0, i)),
        compiler_params=pltpu.CompilerParams(
            dimension_semantics=("parallel", "parallel"),
            vmem_limit_bytes=VMEM_LIMIT),
    )(pvt, code_bias, w8T, whT, bh, whead, bhead)

    # (B, 4, Np_pad) -> (B, Np, 4):  cat([sigma, rgb], -1)
    return out_t[:, :, :Np].transpose(0, 2, 1)


# ---------------------------------------------------------------------------
# Pure-JAX reference (f32) for a sanity check.
# ---------------------------------------------------------------------------
def reference_forward(params, img, pos_emb, view_dir):
    patches = im2col_3x3_lane_dense(img.astype(jnp.float32))    # [B, K, HW]
    feat = jnp.maximum(
        jnp.einsum("bkp,kc->bpc", patches, params["wc"]) + params["bc"], 0.0)
    pooled = jnp.mean(feat, axis=1)
    codes = pooled @ params["wcode"] + params["bcode"]
    sc, ac = codes[:, :CODE_DIM], codes[:, CODE_DIM:]
    pos = pos_emb.astype(jnp.float32)
    vd = view_dir.astype(jnp.float32)
    h = jnp.maximum(jnp.einsum("bnd,dh->bnh", pos, params["s_w0p"])
                    + (sc @ params["s_w0c"])[:, None, :] + params["s_b0"], 0.0)
    h = jnp.maximum(jnp.einsum("bnh,hk->bnk", h, params["s_w1"]) + params["s_b1"], 0.0)
    sigma = jnp.einsum("bnh,ho->bno", h, params["s_wsig"]) + params["s_bsig"]
    g = jnp.maximum(jnp.einsum("bnd,dh->bnh", pos, params["c_w0p"])
                    + jnp.einsum("bnd,dh->bnh", vd, params["c_w0v"])
                    + jnp.einsum("bnh,hk->bnk", h, params["c_w0h"])
                    + (ac @ params["c_w0a"])[:, None, :] + params["c_b0"], 0.0)
    g = jnp.maximum(jnp.einsum("bnh,hk->bnk", g, params["c_w1"]) + params["c_b1"], 0.0)
    rgb = jax.nn.sigmoid(jnp.einsum("bnh,ho->bno", g, params["c_wrgb"]) + params["c_brgb"])
    return jnp.concatenate([sigma, rgb], -1)


if __name__ == "__main__":
    key = jax.random.PRNGKey(0)
    kimg, kpos, kvd, kparam = jax.random.split(key, 4)

    B, Cin, H, W = 2, 3, 16, 16
    Np = 512
    img = jax.random.normal(kimg, (B, Cin, H, W), jnp.float32)
    pos_emb = jax.random.normal(kpos, (B, Np, POS_DIM), jnp.float32)
    view_dir = jax.random.normal(kvd, (B, Np, VIEW_DIM), jnp.float32)

    params = init_params(kparam, cin=Cin)

    fwd = jax.jit(functools.partial(autorf_forward, params))
    ret = fwd(img, pos_emb, view_dir)
    jax.block_until_ready(ret)

    assert ret.shape == (B, Np, 4), ret.shape
    assert bool(jnp.all(jnp.isfinite(ret)))

    ref = reference_forward(params, img, pos_emb, view_dir)
    max_err = float(jnp.max(jnp.abs(ret - ref)))
    assert max_err < 5e-2, f"max abs err vs f32 reference: {max_err}"

    print("KERNEL_OK")
</pallas_src>

<mosaic_0001>
module attributes {stable_mosaic.version = 11 : i64} {
  func.func @encoder_kernel(%arg0: i32, %arg1: i32, %arg2: memref<1x27x256xbf16, #tpu.memory_space<vmem>>, %arg3: memref<32x27xbf16, #tpu.memory_space<vmem>>, %arg4: memref<32x1xf32, #tpu.memory_space<vmem>>, %arg5: memref<1x32x1xf32, #tpu.memory_space<vmem>>, %arg6: memref<32x1xf32, #tpu.memory_space<vmem>>) attributes {dimension_semantics = [#tpu.dimension_semantics<parallel>, #tpu.dimension_semantics<arbitrary>], iteration_bounds = array<i64: 2, 1>, scalar_prefetch = 0 : i64, scratch_operands = 1 : i64, tpu.core_type = #tpu.core_type<tc>, window_params = [{transform_indices = @transform_0, window_bounds = array<i64: 1, 27, 256>}, {pipeline_mode = #tpu.pipeline_mode<synchronous>, transform_indices = @transform_1, window_bounds = array<i64: 32, 27>}, {pipeline_mode = #tpu.pipeline_mode<synchronous>, transform_indices = @transform_2, window_bounds = array<i64: 32, 1>}, {transform_indices = @transform_3, window_bounds = array<i64: 1, 32, 1>}]} {
    %c0_i32 = arith.constant 0 : i32
    %0 = arith.cmpi eq, %arg1, %c0_i32 : i32
    %1 = arith.extui %0 : i1 to i32
    %c0_i32_0 = arith.constant 0 : i32
    %2 = arith.cmpi ne, %1, %c0_i32_0 : i32
    scf.if %2 {
      %cst_15 = arith.constant 0.000000e+00 : f32
      %20 = vector.broadcast %cst_15 : f32 to vector<32x1xf32>
      %c0_16 = arith.constant 0 : index
      %c0_17 = arith.constant 0 : index
      %21 = vector.load %arg6[%c0_16, %c0_17] : memref<32x1xf32, #tpu.memory_space<vmem>>, vector<32x1xf32>
      tpu.vector_store %arg6[%c0_16, %c0_17], %20 {strides = array<i32>} : memref<32x1xf32, #tpu.memory_space<vmem>>, vector<32x1xf32>,
    } else {
    }
    %c0 = arith.constant 0 : index
    %c0_1 = arith.constant 0 : index
    %3 = vector.load %arg3[%c0, %c0_1] : memref<32x27xbf16, #tpu.memory_space<vmem>>, vector<32x27xbf16>
    %c0_2 = arith.constant 0 : index
    %c0_3 = arith.constant 0 : index
    %c0_4 = arith.constant 0 : index
    %4 = vector.load %arg2[%c0_2, %c0_3, %c0_4] : memref<1x27x256xbf16, #tpu.memory_space<vmem>>, vector<1x27x256xbf16>
    %5 = vector.shape_cast %4 : vector<1x27x256xbf16> to vector<27x256xbf16>
    %cst = arith.constant dense<0.000000e+00> : vector<32x256xf32>
    %6 = tpu.matmul %3, %5, %cst {dimension_numbers = #tpu.dot_dimension_numbers<[1], [0], [0], [1], [0, 0, 1, 1], [], []>} : vector<32x27xbf16>, vector<27x256xbf16>, vector<32x256xf32> -> vector<32x256xf32>
    %c0_5 = arith.constant 0 : index
    %c0_6 = arith.constant 0 : index
    %7 = vector.load %arg4[%c0_5, %c0_6] : memref<32x1xf32, #tpu.memory_space<vmem>>, vector<32x1xf32>
    %8 = vector.broadcast %7 : vector<32x1xf32> to vector<32x256xf32>
    %9 = arith.addf %6, %8 : vector<32x256xf32>
    %cst_7 = arith.constant 0.000000e+00 : f32
    %10 = vector.broadcast %cst_7 : f32 to vector<32x256xf32>
    %11 = arith.maximumf %9, %10 : vector<32x256xf32>
    %c0_8 = arith.constant 0 : index
    %c0_9 = arith.constant 0 : index
    %12 = vector.load %arg6[%c0_8, %c0_9] : memref<32x1xf32, #tpu.memory_space<vmem>>, vector<32x1xf32>
    %cst_10 = arith.constant dense<0.000000e+00> : vector<32xf32>
    %13 = vector.multi_reduction <add>, %11, %cst_10 [1] : vector<32x256xf32> to vector<32xf32>
    %14 = vector.shape_cast %13 : vector<32xf32> to vector<32x1xf32>
    %15 = arith.addf %12, %14 : vector<32x1xf32>
    %c0_11 = arith.constant 0 : index
    %c0_12 = arith.constant 0 : index
    %16 = vector.load %arg6[%c0_11, %c0_12] : memref<32x1xf32, #tpu.memory_space<vmem>>, vector<32x1xf32>
    tpu.vector_store %arg6[%c0_11, %c0_12], %15 {strides = array<i32>} : memref<32x1xf32, #tpu.memory_space<vmem>>, vector<32x1xf32>,
    %c0_i32_13 = arith.constant 0 : i32
    %17 = arith.cmpi eq, %arg1, %c0_i32_13 : i32
    %18 = arith.extui %17 : i1 to i32
    %c0_i32_14 = arith.constant 0 : i32
    %19 = arith.cmpi ne, %18, %c0_i32_14 : i32
    scf.if %19 {
      %c0_15 = arith.constant 0 : index
      %c0_16 = arith.constant 0 : index
      %20 = vector.load %arg6[%c0_15, %c0_16] : memref<32x1xf32, #tpu.memory_space<vmem>>, vector<32x1xf32>
      %c0_17 = arith.constant 0 : index
      %c0_18 = arith.constant 0 : index
      %c0_19 = arith.constant 0 : index
      %21 = vector.load %arg5[%c0_17, %c0_18, %c0_19] : memref<1x32x1xf32, #tpu.memory_space<vmem>>, vector<1x32x1xf32>
      %22 = vector.shape_cast %21 : vector<1x32x1xf32> to vector<32x1xf32>
      %23 = vector.shape_cast %20 : vector<32x1xf32> to vector<1x32x1xf32>
      tpu.vector_store %arg5[%c0_17, %c0_18, %c0_19], %23 {strides = array<i32>} : memref<1x32x1xf32, #tpu.memory_space<vmem>>, vector<1x32x1xf32>,
    } else {
    }
    return
  }
  func.func @transform_0(%arg0: i32, %arg1: i32) -> (i32, i32, i32) {
    %c0_i32 = arith.constant 0 : i32
    %c0_i32_0 = arith.constant 0 : i32
    return %arg0, %c0_i32, %arg1 : i32, i32, i32
  }
  func.func @transform_1(%arg0: i32, %arg1: i32) -> (i32, i32) {
    %c0_i32 = arith.constant 0 : i32
    %c0_i32_0 = arith.constant 0 : i32
    %c0_i32_1 = arith.constant 0 : i32
    return %c0_i32, %c0_i32_0 : i32, i32
  }
  func.func @transform_2(%arg0: i32, %arg1: i32) -> (i32, i32) {
    %c0_i32 = arith.constant 0 : i32
    %c0_i32_0 = arith.constant 0 : i32
    %c0_i32_1 = arith.constant 0 : i32
    return %c0_i32, %c0_i32_0 : i32, i32
  }
  func.func @transform_3(%arg0: i32, %arg1: i32) -> (i32, i32, i32) {
    %c0_i32 = arith.constant 0 : i32
    %c0_i32_0 = arith.constant 0 : i32
    %c0_i32_1 = arith.constant 0 : i32
    return %arg0, %c0_i32, %c0_i32_0 : i32, i32, i32
  }
}

module attributes {stable_mosaic.version = 11 : i64} {
  func.func @decoder_kernel(%arg0: i32, %arg1: i32, %arg2: memref<1x8x512xbf16, #tpu.memory_space<vmem>>, %arg3: memref<1x2x128x1xf32, #tpu.memory_space<vmem>>, %arg4: memref<256x8xbf16, #tpu.memory_space<vmem>>, %arg5: memref<3x128x128xbf16, #tpu.memory_space<vmem>>, %arg6: memref<2x128x1xf32, #tpu.memory_space<vmem>>, %arg7: memref<2x4x128xbf16, #tpu.memory_space<vmem>>, %arg8: memref<4x1xf32, #tpu.memory_space<vmem>>, %arg9: memref<1x4x512xf32, #tpu.memory_space<vmem>>) attributes {dimension_semantics = [#tpu.dimension_semantics<parallel>, #tpu.dimension_semantics<parallel>], iteration_bounds = array<i64: 2, 1>, scalar_prefetch = 0 : i64, scratch_operands = 0 : i64, tpu.core_type = #tpu.core_type<tc>, window_params = [{transform_indices = @transform_0, window_bounds = array<i64: 1, 8, 512>}, {transform_indices = @transform_1, window_bounds = array<i64: 1, 2, 128, 1>}, {pipeline_mode = #tpu.pipeline_mode<synchronous>, transform_indices = @transform_2, window_bounds = array<i64: 256, 8>}, {pipeline_mode = #tpu.pipeline_mode<synchronous>, transform_indices = @transform_3, window_bounds = array<i64: 3, 128, 128>}, {pipeline_mode = #tpu.pipeline_mode<synchronous>, transform_indices = @transform_4, window_bounds = array<i64: 2, 128, 1>}, {pipeline_mode = #tpu.pipeline_mode<synchronous>, transform_indices = @transform_5, window_bounds = array<i64: 2, 4, 128>}, {pipeline_mode = #tpu.pipeline_mode<synchronous>, transform_indices = @transform_6, window_bounds = array<i64: 4, 1>}, {transform_indices = @transform_7, window_bounds = array<i64: 1, 4, 512>}]} {
    %c0 = arith.constant 0 : index
    %c0_0 = arith.constant 0 : index
    %c0_1 = arith.constant 0 : index
    %0 = vector.load %arg2[%c0, %c0_0, %c0_1] : memref<1x8x512xbf16, #tpu.memory_space<vmem>>, vector<1x8x512xbf16>
    %1 = vector.shape_cast %0 : vector<1x8x512xbf16> to vector<8x512xbf16>
    %c0_2 = arith.constant 0 : index
    %c0_3 = arith.constant 0 : index
    %c0_4 = arith.constant 0 : index
    %c0_5 = arith.constant 0 : index
    %2 = vector.load %arg3[%c0_2, %c0_3, %c0_4, %c0_5] : memref<1x2x128x1xf32, #tpu.memory_space<vmem>>, vector<1x1x128x1xf32>
    %3 = vector.shape_cast %2 : vector<1x1x128x1xf32> to vector<128x1xf32>
    %c0_6 = arith.constant 0 : index
    %c1 = arith.constant 1 : index
    %c0_7 = arith.constant 0 : index
    %c0_8 = arith.constant 0 : index
    %4 = vector.load %arg3[%c0_6, %c1, %c0_7, %c0_8] : memref<1x2x128x1xf32, #tpu.memory_space<vmem>>, vector<1x1x128x1xf32>
    %5 = vector.shape_cast %4 : vector<1x1x128x1xf32> to vector<128x1xf32>
    %c0_9 = arith.constant 0 : index
    %c0_10 = arith.constant 0 : index
    %6 = vector.load %arg4[%c0_9, %c0_10] : memref<256x8xbf16, #tpu.memory_space<vmem>>, vector<256x8xbf16>
    %cst = arith.constant dense<0.000000e+00> : vector<256x512xf32>
    %7 = tpu.matmul %6, %1, %cst {dimension_numbers = #tpu.dot_dimension_numbers<[1], [0], [0], [1], [0, 0, 1, 1], [], []>} : vector<256x8xbf16>, vector<8x512xbf16>, vector<256x512xf32> -> vector<256x512xf32>
    %8 = vector.extract_strided_slice %7 {offsets = [0, 0], sizes = [128, 512], strides = [1, 1]} : vector<256x512xf32> to vector<128x512xf32>
    %9 = vector.broadcast %3 : vector<128x1xf32> to vector<128x512xf32>
    %10 = arith.addf %8, %9 : vector<128x512xf32>
    %cst_11 = arith.constant 0.000000e+00 : f32
    %11 = vector.broadcast %cst_11 : f32 to vector<128x512xf32>
    %12 = arith.maximumf %10, %11 : vector<128x512xf32>
    %c0_12 = arith.constant 0 : index
    %c0_13 = arith.constant 0 : index
    %c0_14 = arith.constant 0 : index
    %13 = vector.load %arg5[%c0_12, %c0_13, %c0_14] : memref<3x128x128xbf16, #tpu.memory_space<vmem>>, vector<1x128x128xbf16>
    %14 = vector.shape_cast %13 : vector<1x128x128xbf16> to vector<128x128xbf16>
    %15 = arith.truncf %12 : vector<128x512xf32> to vector<128x512xbf16>
    %cst_15 = arith.constant dense<0.000000e+00> : vector<128x512xf32>
    %16 = tpu.matmul %14, %15, %cst_15 {dimension_numbers = #tpu.dot_dimension_numbers<[1], [0], [0], [1], [0, 0, 1, 1], [], []>} : vector<128x128xbf16>, vector<128x512xbf16>, vector<128x512xf32> -> vector<128x512xf32>
    %c0_16 = arith.constant 0 : index
    %c0_17 = arith.constant 0 : index
    %c0_18 = arith.constant 0 : index
    %17 = vector.load %arg6[%c0_16, %c0_17, %c0_18] : memref<2x128x1xf32, #tpu.memory_space<vmem>>, vector<1x128x1xf32>
    %18 = vector.shape_cast %17 : vector<1x128x1xf32> to vector<128x1xf32>
    %19 = vector.broadcast %18 : vector<128x1xf32> to vector<128x512xf32>
    %20 = arith.addf %16, %19 : vector<128x512xf32>
    %cst_19 = arith.constant 0.000000e+00 : f32
    %21 = vector.broadcast %cst_19 : f32 to vector<128x512xf32>
    %22 = arith.maximumf %20, %21 : vector<128x512xf32>
    %c1_20 = arith.constant 1 : index
    %c0_21 = arith.constant 0 : index
    %c0_22 = arith.constant 0 : index
    %23 = vector.load %arg5[%c1_20, %c0_21, %c0_22] : memref<3x128x128xbf16, #tpu.memory_space<vmem>>, vector<1x128x128xbf16>
    %24 = vector.shape_cast %23 : vector<1x128x128xbf16> to vector<128x128xbf16>
    %25 = arith.truncf %22 : vector<128x512xf32> to vector<128x512xbf16>
    %cst_23 = arith.constant dense<0.000000e+00> : vector<128x512xf32>
    %26 = tpu.matmul %24, %25, %cst_23 {dimension_numbers = #tpu.dot_dimension_numbers<[1], [0], [0], [1], [0, 0, 1, 1], [], []>} : vector<128x128xbf16>, vector<128x512xbf16>, vector<128x512xf32> -> vector<128x512xf32>
    %27 = vector.extract_strided_slice %7 {offsets = [128, 0], sizes = [128, 512], strides = [1, 1]} : vector<256x512xf32> to vector<128x512xf32>
    %28 = arith.addf %26, %27 : vector<128x512xf32>
    %29 = vector.broadcast %5 : vector<128x1xf32> to vector<128x512xf32>
    %30 = arith.addf %28, %29 : vector<128x512xf32>
    %cst_24 = arith.constant 0.000000e+00 : f32
    %31 = vector.broadcast %cst_24 : f32 to vector<128x512xf32>
    %32 = arith.maximumf %30, %31 : vector<128x512xf32>
    %c2 = arith.constant 2 : index
    %c0_25 = arith.constant 0 : index
    %c0_26 = arith.constant 0 : index
    %33 = vector.load %arg5[%c2, %c0_25, %c0_26] : memref<3x128x128xbf16, #tpu.memory_space<vmem>>, vector<1x128x128xbf16>
    %34 = vector.shape_cast %33 : vector<1x128x128xbf16> to vector<128x128xbf16>
    %35 = arith.truncf %32 : vector<128x512xf32> to vector<128x512xbf16>
    %cst_27 = arith.constant dense<0.000000e+00> : vector<128x512xf32>
    %36 = tpu.matmul %34, %35, %cst_27 {dimension_numbers = #tpu.dot_dimension_numbers<[1], [0], [0], [1], [0, 0, 1, 1], [], []>} : vector<128x128xbf16>, vector<128x512xbf16>, vector<128x512xf32> -> vector<128x512xf32>
    %c1_28 = arith.constant 1 : index
    %c0_29 = arith.constant 0 : index
    %c0_30 = arith.constant 0 : index
    %37 = vector.load %arg6[%c1_28, %c0_29, %c0_30] : memref<2x128x1xf32, #tpu.memory_space<vmem>>, vector<1x128x1xf32>
    %38 = vector.shape_cast %37 : vector<1x128x1xf32> to vector<128x1xf32>
    %39 = vector.broadcast %38 : vector<128x1xf32> to vector<128x512xf32>
    %40 = arith.addf %36, %39 : vector<128x512xf32>
    %cst_31 = arith.constant 0.000000e+00 : f32
    %41 = vector.broadcast %cst_31 : f32 to vector<128x512xf32>
    %42 = arith.maximumf %40, %41 : vector<128x512xf32>
    %c0_32 = arith.constant 0 : index
    %c0_33 = arith.constant 0 : index
    %c0_34 = arith.constant 0 : index
    %43 = vector.load %arg7[%c0_32, %c0_33, %c0_34] : memref<2x4x128xbf16, #tpu.memory_space<vmem>>, vector<1x4x128xbf16>
    %44 = vector.shape_cast %43 : vector<1x4x128xbf16> to vector<4x128xbf16>
    %45 = arith.truncf %22 : vector<128x512xf32> to vector<128x512xbf16>
    %cst_35 = arith.constant dense<0.000000e+00> : vector<4x512xf32>
    %46 = tpu.matmul %44, %45, %cst_35 {dimension_numbers = #tpu.dot_dimension_numbers<[1], [0], [0], [1], [0, 0, 1, 1], [], []>} : vector<4x128xbf16>, vector<128x512xbf16>, vector<4x512xf32> -> vector<4x512xf32>
    %c1_36 = arith.constant 1 : index
    %c0_37 = arith.constant 0 : index
    %c0_38 = arith.constant 0 : index
    %47 = vector.load %arg7[%c1_36, %c0_37, %c0_38] : memref<2x4x128xbf16, #tpu.memory_space<vmem>>, vector<1x4x128xbf16>
    %48 = vector.shape_cast %47 : vector<1x4x128xbf16> to vector<4x128xbf16>
    %49 = arith.truncf %42 : vector<128x512xf32> to vector<128x512xbf16>
    %cst_39 = arith.constant dense<0.000000e+00> : vector<4x512xf32>
    %50 = tpu.matmul %48, %49, %cst_39 {dimension_numbers = #tpu.dot_dimension_numbers<[1], [0], [0], [1], [0, 0, 1, 1], [], []>} : vector<4x128xbf16>, vector<128x512xbf16>, vector<4x512xf32> -> vector<4x512xf32>
    %51 = arith.addf %46, %50 : vector<4x512xf32>
    %c0_40 = arith.constant 0 : index
    %c0_41 = arith.constant 0 : index
    %52 = vector.load %arg8[%c0_40, %c0_41] : memref<4x1xf32, #tpu.memory_space<vmem>>, vector<4x1xf32>
    %53 = vector.broadcast %52 : vector<4x1xf32> to vector<4x512xf32>
    %54 = arith.addf %51, %53 : vector<4x512xf32>
    %55 = tpu.iota {dimensions = array<i32: 0>} : vector<4x512xi32>
    %c0_i32 = arith.constant 0 : i32
    %56 = vector.broadcast %c0_i32 : i32 to vector<4x512xi32>
    %57 = arith.cmpi eq, %55, %56 : vector<4x512xi32>
    %58 = arith.negf %54 : vector<4x512xf32>
    %59 = math.exp %58 : vector<4x512xf32>
    %cst_42 = arith.constant 1.000000e+00 : f32
    %60 = vector.broadcast %cst_42 : f32 to vector<4x512xf32>
    %61 = arith.addf %60, %59 : vector<4x512xf32>
    %62 = arith.divf %60, %61 : vector<4x512xf32>
    %63 = arith.select %57, %54, %62 : vector<4x512xi1>, vector<4x512xf32>
    %c0_43 = arith.constant 0 : index
    %c0_44 = arith.constant 0 : index
    %c0_45 = arith.constant 0 : index
    %64 = vector.load %arg9[%c0_43, %c0_44, %c0_45] : memref<1x4x512xf32, #tpu.memory_space<vmem>>, vector<1x4x512xf32>
    %65 = vector.shape_cast %64 : vector<1x4x512xf32> to vector<4x512xf32>
    %66 = vector.shape_cast %63 : vector<4x512xf32> to vector<1x4x512xf32>
    tpu.vector_store %arg9[%c0_43, %c0_44, %c0_45], %66 {strides = array<i32>} : memref<1x4x512xf32, #tpu.memory_space<vmem>>, vector<1x4x512xf32>,
    return
  }
  func.func @transform_0(%arg0: i32, %arg1: i32) -> (i32, i32, i32) {
    %c0_i32 = arith.constant 0 : i32
    %c0_i32_0 = arith.constant 0 : i32
    return %arg0, %c0_i32, %arg1 : i32, i32, i32
  }
  func.func @transform_1(%arg0: i32, %arg1: i32) -> (i32, i32, i32, i32) {
    %c0_i32 = arith.constant 0 : i32
    %c0_i32_0 = arith.constant 0 : i32
    %c0_i32_1 = arith.constant 0 : i32
    %c0_i32_2 = arith.constant 0 : i32
    return %arg0, %c0_i32, %c0_i32_0, %c0_i32_1 : i32, i32, i32, i32
  }
  func.func @transform_2(%arg0: i32, %arg1: i32) -> (i32, i32) {
    %c0_i32 = arith.constant 0 : i32
    %c0_i32_0 = arith.constant 0 : i32
    %c0_i32_1 = arith.constant 0 : i32
    return %c0_i32, %c0_i32_0 : i32, i32
  }
  func.func @transform_3(%arg0: i32, %arg1: i32) -> (i32, i32, i32) {
    %c0_i32 = arith.constant 0 : i32
    %c0_i32_0 = arith.constant 0 : i32
    %c0_i32_1 = arith.constant 0 : i32
    %c0_i32_2 = arith.constant 0 : i32
    return %c0_i32, %c0_i32_0, %c0_i32_1 : i32, i32, i32
  }
  func.func @transform_4(%arg0: i32, %arg1: i32) -> (i32, i32, i32) {
    %c0_i32 = arith.constant 0 : i32
    %c0_i32_0 = arith.constant 0 : i32
    %c0_i32_1 = arith.constant 0 : i32
    %c0_i32_2 = arith.constant 0 : i32
    return %c0_i32, %c0_i32_0, %c0_i32_1 : i32, i32, i32
  }
  func.func @transform_5(%arg0: i32, %arg1: i32) -> (i32, i32, i32) {
    %c0_i32 = arith.constant 0 : i32
    %c0_i32_0 = arith.constant 0 : i32
    %c0_i32_1 = arith.constant 0 : i32
    %c0_i32_2 = arith.constant 0 : i32
    return %c0_i32, %c0_i32_0, %c0_i32_1 : i32, i32, i32
  }
  func.func @transform_6(%arg0: i32, %arg1: i32) -> (i32, i32) {
    %c0_i32 = arith.constant 0 : i32
    %c0_i32_0 = arith.constant 0 : i32
    %c0_i32_1 = arith.constant 0 : i32
    return %c0_i32, %c0_i32_0 : i32, i32
  }
  func.func @transform_7(%arg0: i32, %arg1: i32) -> (i32, i32, i32) {
    %c0_i32 = arith.constant 0 : i32
    %c0_i32_0 = arith.constant 0 : i32
    return %arg0, %c0_i32, %arg1 : i32, i32, i32
  }
}

</mosaic_0001>

<bundles_post_ra>
// kernel: autorf_forward.2
= control target key start
LH: loop header
LB: loop body
LE: loop exit
PB: predicated region body
PF: predicated region fallthrough
CT: control target
= control target key end

     0   :  { %s561_s12 = smov 0   ;;  %s563_s13 = smov 0   ;;  %s631_s0 = inlined_call_operand.vmem [shape: bf16[2,27,256], index: 0, kind: input, shape index: {}]   ;;  %s632_s1 = inlined_call_operand.vmem [shape: bf16[32,27], index: 1, kind: input, shape index: {}]   ;;  %s633_s2 = inlined_call_operand.vmem [shape: f32[32,1], index: 2, kind: input, shape index: {}]   ;;  %s634_s3 = inlined_call_operand.vmem [shape: f32[2,32,1], index: 3, kind: output, shape index: {}]  }
   0x1   :  { %s565_s14 = smov 0  }
   0x2 LB: > { %s25_s15 = sadd.s32 1, %s532_s13  ;;  %p456_p0 = scmp.ge.s32.totalorder %s536_s14, 1  ;;  %s536_s14 = sphi %s565_s14, %s13_s14   ;;  %s532_s13 = sphi %s563_s13, %s636_s13   ;;  %s528_s12 = sphi %s561_s12, %s635_s12  }
   0x3   : > { %p27_p1 = scmp.ge.s32.totalorder %s25_s15, 2  ;;  %p156_p2 = scmp.lt.s32.totalorder %s536_s14, 3 }
   0x5   : > { %s638_s15 = smov (%p27_p1, %s25_s15), 0  ;;  %p157_p3 = pnand %p456_p0, %p156_p2 }
   0x6   : > { %p185_p4 = scmp.lt.s32.totalorder (!%p157_p3), %s528_s12, 1  ;;  %vm276_vm0 = vcmask (!%p157_p3), 1044480   ;;  %v538_v0 = vmov (!%p157_p3), 0   ;;  %v217_v1 = vld [vmem:[%s633_s2] sm:$0xff] (!%p157_p3)  ;;  %v219_v2 = vld [vmem:[%s633_s2 + $0x10] sm:$0xff] (!%p157_p3)  ;;  %vm277_vm1 = vcmask (!%p157_p3), 1045504  }
   0x7   : > { %160 = sbr.rel (%p157_p3) target bundleno = 406 (0x196), region = 32  ;;  %318 = vmatprep.mubr.bf16.mxu0 (!%p157_p3), %v538_v0  ;;  %328 = vmatprep.mubr.bf16.mxu1 (!%p157_p3), %v538_v0  ;;  %v539_v3 = vmov (!%p157_p3), 65535   ;;  %v218_v5 = vld [vmem:[%s633_s2 + $0x8] sm:$0xff] (!%p157_p3)  ;;  %v220_v6 = vld [vmem:[%s633_s2 + $0x18] sm:$0xff] (!%p157_p3)  ;;  %v512_v14 = vld [vmem:[%s632_s1] sm:$0xff] (!%p157_p3)   ;;  %vm269_vm2 = vcmask (!%p157_p3), 220160  }
   0x8   : > { %504 = vset.pattern.permute.xlu0 (!%p157_p3), %v538_v0  ;;  %505 = vset.pattern.permute.xlu1 (!%p157_p3), %v538_v0  ;;  %v278_v4 = vsel (!%p157_p3), %vm276_vm0, 4294967295, %v539_v3  ;;  %v513_v15 = vld [vmem:[%s632_s1 + $0x8] sm:$0xff] (!%p157_p3)   ;;  %vm204_vm3 = vcmask (!%p157_p3), 7168   ;;  %v540_v16 = vmov (!%p157_p3), 0.0  }
   0x9   : > { %223 = vperm.xlu0 (!%p157_p3), %504, %v217_v1   ;;  %233 = vperm.xlu1 (!%p157_p3), %505, %v219_v2   ;;  %v279_v9 = vsel (!%p157_p3), %vm277_vm1, %v278_v4, 0  ;;  %205 = vst.msk [vmem:[#allocation2] sm:$0xff] (!%p157_p3), %vm204_vm3, %v540_v16  ;;  %206 = vst.msk [vmem:[#allocation2 + $0x8] sm:$0xff] (!%p157_p3), %vm204_vm3, %v540_v16 }
   0xa   : > { %207 = vst.msk [vmem:[#allocation2 + $0x10] sm:$0xff] (!%p157_p3), %vm204_vm3, %v540_v16  ;;  %208 = vst.msk [vmem:[#allocation2 + $0x18] sm:$0xff] (!%p157_p3), %vm204_vm3, %v540_v16 }
   0xd   : > { %228 = vperm.xlu0 (!%p157_p3), %504, %v218_v5   ;;  %238 = vperm.xlu1 (!%p157_p3), %505, %v220_v6  }
   0xe   : > { %s640_s12 = smov (!%p185_p4, %s528_s12), 1 }
   0xf   : > { %s471_s20 = sshll.u32 %s640_s12, 5 }
  0x10   : > { %s192_s23 = scalar_lea.vmem %s631_s0, %s471_s20  ;;  %v347_v49 = vld [vmem:[#allocation2] sm:$0xff]  ;;  %v348_v51 = vld [vmem:[#allocation2 + $0x8] sm:$0xff]  ;;  %s198_s7 = scalar_lea.vmem %s634_s3, %s471_s20 }
  0x11   : > { %v506_v7 = vld [vmem:[%s192_s23 + $0x4] ss:$8 sps:$4 sm:$0xff]   ;;  %v508_v8 = vld [vmem:[%s192_s23] ss:$8 sps:$4 sm:$0xff]   ;;  %v349_v54 = vld [vmem:[#allocation2 + $0x10] sm:$0xff] }
  0x12   : > { %286 = vmatprep.subr.bf16.mxu0 %v506_v7  ;;  %473 = vmatprep.subr.bf16.mxu1 %v506_v7  ;;  %v509_v10 = vld [vmem:[%s192_s23 + $0x14] ss:$8 sps:$4 sm:$0x3f]   ;;  %v511_v11 = vld [vmem:[%s192_s23 + $0x10] ss:$8 sps:$4 sm:$0x3f]  }
  0x13   : > { %287 = vmatpush1.bf16.msra.mxu0 %v508_v8  ;;  %475 = vmatpush1.bf16.msra.mxu1 %v508_v8  ;;  %v284_v12 = vand.u32 %v509_v10, %v279_v9  ;;  %v281_v13 = vand.u32 %v511_v11, %v279_v9  ;;  %v350_v58 = vld [vmem:[#allocation2 + $0x18] sm:$0xff] }
  0x15   : > { %288 = vmatprep.subr.bf16.mxu0 %v284_v12  ;;  %474 = vmatprep.subr.bf16.mxu1 %v284_v12 }
  0x17   : > { %289 = vmatpush1.bf16.msra.mxu0 %v281_v13  ;;  %476 = vmatpush1.bf16.msra.mxu1 %v281_v13 }
  0x1a   : > { %467 = vmatmul.mubr.msk.bf16.vlgmr.msra.gmra.mrb[0].mxu0 %vm269_vm2, %v512_v14  ;;  %468 = vmatmul.mubr.msk.bf16.vlgmr.msra.gmra.mrb[0].mxu1 %vm269_vm2, %v513_v15 }
  0x88   : > { %v224_v17 = vpop.permute.xlu0 %223  ;;  %v234_v18 = vpop.permute.xlu1 %233 }
  0x8c   : > { %v229_v19 = vpop.permute.xlu0 %228  ;;  %v239_v20 = vpop.permute.xlu1 %238 }
  0xed   : > { %v320_v21 = vpop.f32.mrb[0].mxu0  ;;  %v330_v22 = vpop.f32.mrb[0].mxu1 }
  0xee   : > { %v321_v23 = vadd.f32 %v320_v21, %v224_v17  ;;  %v322_v24 = vpop.f32.mrb[1].mxu0  ;;  %v331_v25 = vadd.f32 %v330_v22, %v234_v18  ;;  %v332_v26 = vpop.f32.mrb[1].mxu1 }
  0xef   : > { %v323_v27 = vadd.f32 %v322_v24, %v224_v17  ;;  %v324_v28 = vpop.f32.mrb[2].mxu0  ;;  %v333_v29 = vadd.f32 %v332_v26, %v234_v18  ;;  %v334_v30 = vpop.f32.mrb[2].mxu1 }
  0xf0   : > { %v339_v31 = vmax.f32 %v321_v23, 0.0  ;;  %v343_v32 = vmax.f32 %v331_v25, 0.0  ;;  %v325_v33 = vadd.f32 %v324_v28, %v229_v19  ;;  %v326_v34 = vpop.f32.mrb[3].mxu0  ;;  %v335_v35 = vadd.f32 %v334_v30, %v239_v20  ;;  %v336_v36 = vpop.f32.mrb[3].mxu1 }
  0xf1   : > { %v340_v37 = vmax.f32 %v323_v27, 0.0  ;;  %v344_v38 = vmax.f32 %v333_v29, 0.0  ;;  %v327_v39 = vadd.f32 %v326_v34, %v229_v19  ;;  %v337_v40 = vadd.f32 %v336_v36, %v239_v20 }
  0xf2   : > { %v341_v41 = vmax.f32 %v325_v33, 0.0  ;;  %v345_v42 = vmax.f32 %v335_v35, 0.0 }
  0xf3   : > { %v342_v43 = vmax.f32 %v327_v39, 0.0  ;;  %v346_v44 = vmax.f32 %v337_v40, 0.0  ;;  %v351_v45 = vadd.f32 %v340_v37, %v339_v31  ;;  %v357_v46 = vadd.f32 %v344_v38, %v343_v32 }
  0xf5   : > { %352 = vadd.xlane.f32.xlu0 %v351_v45  ;;  %v354_v47 = vadd.f32 %v342_v43, %v341_v41  ;;  %v360_v48 = vadd.f32 %v346_v44, %v345_v42 }
  0xf7   : > { %355 = vadd.xlane.f32.xlu1 %v354_v47 }
  0xf9   : > { %358 = vadd.xlane.f32.xlu0 %v357_v46 }
  0xfd   : > { %361 = vadd.xlane.f32.xlu0 %v360_v48 }
 0x182   : > { %v353_v50 = vpop.xlane.xlu0 %352 }
 0x183   : > { %v363_v52 = vadd.f32 %v353_v50, %v347_v49 }
 0x184   : > { %v356_v53 = vpop.xlane.xlu1 %355 }
 0x185   : > { %368 = vst.msk [vmem:[#allocation2] sm:$0xff] %vm204_vm3, %v363_v52  ;;  %v364_v55 = vadd.f32 %v356_v53, %v348_v51 }
 0x186   : > { %v359_v56 = vpop.xlane.xlu0 %358 }
 0x187   : > { %369 = vst.msk [vmem:[#allocation2 + $0x8] sm:$0xff] %vm204_vm3, %v364_v55  ;;  %v365_v57 = vadd.f32 %v359_v56, %v349_v54 }
 0x189   : > { %370 = vst.msk [vmem:[#allocation2 + $0x10] sm:$0xff] %vm204_vm3, %v365_v57 }
 0x18a   : > { %v362_v59 = vpop.xlane.xlu0 %361 }
 0x18b   : > { %v366_v60 = vadd.f32 %v362_v59, %v350_v58 }
 0x18c   : > { %v375_v61 = vld [vmem:[#allocation2] sm:$0xff] }
 0x18d   : > { %379 = vst.msk [vmem:[%s198_s7] sm:$0xff] %vm204_vm3, %v375_v61  ;;  %371 = vst.msk [vmem:[#allocation2 + $0x18] sm:$0xff] %vm204_vm3, %v366_v60 }
 0x18e   : > { %v376_v62 = vld [vmem:[#allocation2 + $0x8] sm:$0xff] }
 0x18f   : > { %380 = vst.msk [vmem:[%s198_s7 + $0x8] sm:$0xff] %vm204_vm3, %v376_v62 }
 0x190   : > { %v377_v63 = vld [vmem:[#allocation2 + $0x10] sm:$0xff] }
 0x191   : > { %381 = vst.msk [vmem:[%s198_s7 + $0x10] sm:$0xff] %vm204_vm3, %v377_v63 }
 0x194   : > { %v378_v0 = vld [vmem:[#allocation2 + $0x18] sm:$0xff] }
 0x195   : > { %382 = vst.msk [vmem:[%s198_s7 + $0x18] sm:$0xff] %vm204_vm3, %v378_v0 }
 0x196 PF: > { %s13_s14 = sadd.s32 1, %s536_s14   ;;  %s635_s12 = smov %s532_s13 }
 0x197   : > { %p10_p5 = scmp.ge.s32.totalorder %s13_s14, 4   ;;  %s636_s13 = smov %s638_s15 }
 0x199   :  { %12 = sbr.rel (!%p10_p5) target bundleno = 2 (0x2), region = 70 }

// kernel: autorf_forward.3
= control target key start
LH: loop header
LB: loop body
LE: loop exit
PB: predicated region body
PF: predicated region fallthrough
CT: control target
= control target key end

     0   :  { %12 = vsyncpa [#allocation3], 0  ;;  %s4083_s0 = inlined_call_operand.vmem [shape: bf16[2,8,512], index: 0, kind: input, shape index: {}]   ;;  %s4084_s1 = inlined_call_operand.vmem [shape: f32[2,2,128,1], index: 1, kind: input, shape index: {}]   ;;  %s4085_s2 = inlined_call_operand.vmem [shape: bf16[256,8], index: 2, kind: input, shape index: {}]   ;;  %s4086_s3 = inlined_call_operand.vmem [shape: bf16[3,128,128], index: 3, kind: input, shape index: {}]   ;;  %s4087_s4 = inlined_call_operand.vmem [shape: f32[2,128,1], index: 4, kind: input, shape index: {}]   ;;  %s4088_s5 = inlined_call_operand.vmem [shape: bf16[2,4,128], index: 5, kind: input, shape index: {}]   ;;  %s4089_s6 = inlined_call_operand.vmem [shape: f32[4,1], index: 6, kind: input, shape index: {}]   ;;  %s4090_s7 = inlined_call_operand.hbm [shape: f32[2,4,512], index: 7, kind: output, shape index: {}]  }
   0x1   :  { %14 = vsyncpa [#allocation3 + $0x1], 0  ;;  %s3463_s24 = smov 0   ;;  %s3465_s25 = smov 0  }
   0x2   :  { %s3467_s26 = smov 0   ;;  %s3469_s27 = smov 0  }
   0x3   :  { %s3471_s28 = smov 0   ;;  %s3473_s29 = smov 0  }
   0x4 LB: > { %s2994_s30 = sadd.s32 4294967295, %s3419_s29   ;;  %s2995_s8 = sadd.s32 4294967294, %s3419_s29   ;;  %s3419_s29 = sphi %s3473_s29, %s20_s29   ;;  %s3415_s28 = sphi %s3471_s28, %s4097_s28   ;;  %s3411_s27 = sphi %s3469_s27, %s4096_s27   ;;  %s3407_s26 = sphi %s3467_s26, %s4095_s26   ;;  %s3403_s25 = sphi %s3465_s25, %s4094_s25   ;;  %s3399_s24 = sphi %s3463_s24, %s4093_s24  }
   0x5   : > { %s32_s9 = sadd.s32 1, %s3415_s28  ;;  %s200_s10 = sadd.s32 1, %s3407_s26 }
   0x6   : > { %p34_p0 = scmp.ge.s32.totalorder %s32_s9, 2  ;;  %p210_p1 = scmp.ne.s32.totalorder %s3407_s26, %s3403_s25 }
   0x7   : > { %p211_p2 = scmp.eq.s32.totalorder %s2994_s30, 1  ;;  %p216_p3 = scmp.ne.s32.totalorder %s3403_s25, %s3399_s24 }
   0x8   : > { %s4099_s9 = smov (%p34_p0, %s32_s9), 0  ;;  %p217_p5 = scmp.eq.s32.totalorder %s2995_s8, 1 }
   0x9   : > { %p3503_p4 = por %p211_p2, %p210_p1  ;;  %s195_s12 = ssub.s32 %s3415_s28, %s4099_s9 }
   0xa   : > { %p2998_p6 = scmp.ge.s32.totalorder %s3419_s29, 1  ;;  %p198_p7 = scmp.eq.s32.totalorder %s195_s12, 0 }
   0xb   : > { %p3510_p8 = por %p217_p5, %p216_p3  ;;  %p271_p9 = scmp.lt.s32.totalorder %s3419_s29, 3 }
   0xc   : > { %s3516_s14 = scalar_select %p198_p7, %s3407_s26, %s200_s10  }
   0xd   : > { %p272_p10 = pnand %p2998_p6, %p271_p9 }
   0xe   : > { %p313_p11 = scmp.lt.s32.totalorder (!%p272_p10), %s3411_s27, 1  ;;  %v3421_v0 = vmov (!%p272_p10), 0   ;;  %vm535_vm0 = vcmask (!%p272_p10), 1043456   ;;  %v3285_v12 = vld [vmem:[%s4085_s2] sm:$0xff] (!%p272_p10)   ;;  %vm486_vm1 = vcmask (!%p272_p10), 64512   ;;  %v3286_v18 = vld [vmem:[%s4085_s2 + $0x8] sm:$0xff] (!%p272_p10)  }
   0xf   : > { %275 = sbr.rel (%p272_p10) target bundleno = 1452 (0x5ac), region = 48  ;;  %3280 = vset.pattern.permute.xlu1 (!%p272_p10), %v3421_v0  ;;  %3279 = vset.pattern.permute.xlu0 (!%p272_p10), %v3421_v0  ;;  %v3287_v23 = vld [vmem:[%s4085_s2 + $0x10] sm:$0xff] (!%p272_p10)   ;;  %v3288_v28 = vld [vmem:[%s4085_s2 + $0x18] sm:$0xff] (!%p272_p10)   ;;  %v1191_v29 = vld [vmem:[%s4087_s4 + $0x8] sm:$0xff] (!%p272_p10)  ;;  %s309_s22 = sand.u32 (!%p272_p10), 1, %s3403_s25  }
  0x10   : > { %580 = vmatprep.mubr.bf16.mxu0 (!%p272_p10), %v3421_v0  ;;  %773 = vmatprep.mubr.bf16.mxu1 (!%p272_p10), %v3421_v0  ;;  %v1190_v30 = vld [vmem:[%s4087_s4] sm:$0xff] (!%p272_p10)  ;;  %v1193_v31 = vld [vmem:[%s4087_s4 + $0x18] sm:$0xff] (!%p272_p10)  ;;  %v1192_v32 = vld [vmem:[%s4087_s4 + $0x10] sm:$0xff] (!%p272_p10)  ;;  %s3158_s30 = sshll.u32 (!%p272_p10), %s3411_s27, 8  ;;  %s3422_s18 = smov (!%p272_p10), [#allocation2]  }
  0x11   : > { %v3289_v33 = vld [vmem:[%s4085_s2 + $0x20] sm:$0xff] (!%p272_p10)   ;;  %v1195_v34 = vld [vmem:[%s4087_s4 + $0x28] sm:$0xff] (!%p272_p10)  ;;  %v1197_v36 = vld [vmem:[%s4087_s4 + $0x38] sm:$0xff] (!%p272_p10) }
  0x12   : > { %v1194_v35 = vld [vmem:[%s4087_s4 + $0x20] sm:$0xff] (!%p272_p10)  ;;  %v1196_v37 = vld [vmem:[%s4087_s4 + $0x30] sm:$0xff] (!%p272_p10)  ;;  %v3290_v38 = vld [vmem:[%s4085_s2 + $0x28] sm:$0xff] (!%p272_p10)  }
  0x13   : > { %v1199_v39 = vld [vmem:[%s4087_s4 + $0x48] sm:$0xff] (!%p272_p10)  ;;  %v1198_v40 = vld [vmem:[%s4087_s4 + $0x40] sm:$0xff] (!%p272_p10)  ;;  %v1201_v41 = vld [vmem:[%s4087_s4 + $0x58] sm:$0xff] (!%p272_p10) }
  0x14   : > { %v1200_v42 = vld [vmem:[%s4087_s4 + $0x50] sm:$0xff] (!%p272_p10)  ;;  %v1203_v44 = vld [vmem:[%s4087_s4 + $0x68] sm:$0xff] (!%p272_p10)  ;;  %v1202_v45 = vld [vmem:[%s4087_s4 + $0x60] sm:$0xff] (!%p272_p10) }
  0x15   : > { %v3291_v43 = vld [vmem:[%s4085_s2 + $0x30] sm:$0xff] (!%p272_p10)   ;;  %v1205_v46 = vld [vmem:[%s4087_s4 + $0x78] sm:$0xff] (!%p272_p10) }
  0x16   : > { %s314_s15 = scalar_select %p313_p11, %s3411_s27, 1  ;;  %v1204_v47 = vld [vmem:[%s4087_s4 + $0x70] sm:$0xff]  ;;  %v3292_v48 = vld [vmem:[%s4085_s2 + $0x38] sm:$0xff]  }
  0x17   : > { %s2890_s27 = scalar_lea.sflag [#allocation3], %s309_s22 }
  0x18   : > { %s3157_s16 = sshll.u32 %s314_s15, 8  ;;  %s3156_s17 = sshll.u32 %s314_s15, 4 }
  0x19   : > { %s3527_s20 = scalar_lea.vmem %s4084_s1, %s3157_s16  ;;  %s320_s23 = scalar_lea.vmem %s4083_s0, %s3156_s17 }
  0x1a   : > { %v333_v1 = vld [vmem:[%s3527_s20 + $0x10] sm:$0xff]  ;;  %v331_v2 = vld [vmem:[%s3527_s20] sm:$0xff]  ;;  %v330_v5 = vld [vmem:[%s320_s23 + $0x8] sm:$0xff]  ;;  %s4036_s16 = scalar_lea.hbm %s4090_s7, %s3158_s30 }
  0x1b   : > { %v329_v3 = vld [vmem:[%s320_s23] sm:$0xff]  ;;  %946 = vperm.xlu1 %3280, %v333_v1   ;;  %936 = vperm.xlu0 %3279, %v331_v2   ;;  %v3039_v7 = vcombine.high %v330_v5, %v330_v5  ;;  %v3038_v8 = vcombine.low %v330_v5, %v330_v5  ;;  %v334_v9 = vld [vmem:[%s3527_s20 + $0x18] sm:$0xff]  ;;  %v332_v11 = vld [vmem:[%s3527_s20 + $0x8] sm:$0xff]  ;;  %s2999_s23 = sshll.u32 %s309_s22, 4 }
  0x1c   : > { %v3037_v4 = vcombine.high %v329_v3, %v329_v3  ;;  %v3036_v6 = vcombine.low %v329_v3, %v329_v3  ;;  %v336_v14 = vld [vmem:[%s3527_s20 + $0x28] sm:$0xff]  ;;  %v335_v15 = vld [vmem:[%s3527_s20 + $0x20] sm:$0xff]  ;;  %v338_v16 = vld [vmem:[%s3527_s20 + $0x38] sm:$0xff]  ;;  %s311_s8 = scalar_lea.vmem [#allocation2], %s2999_s23 }
  0x1d   : > { %3057 = vmatprep.subr.msk.bf16.mxu1 %vm535_vm0, %v3039_v7  ;;  %v543_v13 = vsel %vm535_vm0, %v3038_v8, 0  ;;  %v337_v17 = vld [vmem:[%s3527_s20 + $0x30] sm:$0xff]  ;;  %v340_v19 = vld [vmem:[%s3527_s20 + $0x48] sm:$0xff]  ;;  %v339_v20 = vld [vmem:[%s3527_s20 + $0x40] sm:$0xff]  ;;  %s2906_s10 = sshll.u32 %s311_s8, 4  ;;  %s4038_s10 = int_to_ptr.vmem [resolvable:$true] %s2906_s10 }
  0x1e   : > { %3040 = vmatprep.subr.msk.bf16.mxu0 %vm535_vm0, %v3037_v4  ;;  %v537_v10 = vsel %vm535_vm0, %v3036_v6, 0  ;;  %742 = vmatpush1.bf16.msra.mxu1 %v543_v13  ;;  %v342_v21 = vld [vmem:[%s3527_s20 + $0x58] sm:$0xff]  ;;  %v341_v22 = vld [vmem:[%s3527_s20 + $0x50] sm:$0xff]  ;;  %v344_v24 = vld [vmem:[%s3527_s20 + $0x68] sm:$0xff]  ;;  %s3341_s17 = scalar_lea.vmem %s4038_s10, 256 }
  0x1f   : > { %549 = vmatpush1.bf16.msra.mxu0 %v537_v10  ;;  %951 = vperm.xlu1 %3280, %v334_v9   ;;  %v343_v25 = vld [vmem:[%s3527_s20 + $0x60] sm:$0xff]  ;;  %v346_v26 = vld [vmem:[%s3527_s20 + $0x78] sm:$0xff]  ;;  %v345_v27 = vld [vmem:[%s3527_s20 + $0x70] sm:$0xff]  ;;  %p3342_p12 = scmp.ne.s32.totalorder %s4038_s10, %s3341_s17 }
  0x20   : > { %941 = vperm.xlu0 %3279, %v332_v11   ;;  %v3005_v49 = vld [vmem:[%s3527_s20 + $0x88] sm:$0xff]  ;;  %v3004_v50 = vld [vmem:[%s3527_s20 + $0x80] sm:$0xff]  ;;  %v3007_v51 = vld [vmem:[%s3527_s20 + $0x98] sm:$0xff] }
  0x21   : > { %3058 = vmatmul.mubr.msk.bf16.vlgmr.msra.gmra.mrb[0].mxu1 %vm486_vm1, %v3285_v12  ;;  %v3006_v52 = vld [vmem:[%s3527_s20 + $0x90] sm:$0xff]  ;;  %v3009_v53 = vld [vmem:[%s3527_s20 + $0xa8] sm:$0xff]  ;;  %v3008_v54 = vld [vmem:[%s3527_s20 + $0xa0] sm:$0xff]  ;;  %p3343_p13 = pnand %p3342_p12, %p3503_p4 }
  0x22   : > { %3041 = vmatmul.mubr.msk.bf16.vlgmr.msra.gmra.mrb[0].mxu0 %vm486_vm1, %v3285_v12  ;;  %783 = vmatprep.mubr.bf16.mxu1 %v3421_v0  ;;  %v3011_v55 = vld [vmem:[%s3527_s20 + $0xb8] sm:$0xff]  ;;  %v3010_v56 = vld [vmem:[%s3527_s20 + $0xb0] sm:$0xff]  ;;  %v3013_v57 = vld [vmem:[%s3527_s20 + $0xc8] sm:$0xff] }
  0x23   : > { %590 = vmatprep.mubr.bf16.mxu0 %v3421_v0  ;;  %961 = vperm.xlu1 %3280, %v336_v14   ;;  %v3012_v58 = vld [vmem:[%s3527_s20 + $0xc0] sm:$0xff]  ;;  %v3015_v59 = vld [vmem:[%s3527_s20 + $0xd8] sm:$0xff]  ;;  %v3014_v60 = vld [vmem:[%s3527_s20 + $0xd0] sm:$0xff]  ;;  %p3344_p0 = pneg %p3343_p13 }
  0x24   : > { %956 = vperm.xlu0 %3279, %v335_v15   ;;  %v3017_v61 = vld [vmem:[%s3527_s20 + $0xe8] sm:$0xff]  ;;  %v3016_v62 = vld [vmem:[%s3527_s20 + $0xe0] sm:$0xff]  ;;  %v3019_v63 = vld [vmem:[%s3527_s20 + $0xf8] sm:$0xff] }
  0x25   : > { %v3018_v1 = vld [vmem:[%s3527_s20 + $0xf0] sm:$0xff]  ;;  %v3123_v2 = vld [vmem:[%s4087_s4 + $0x88] sm:$0xff]  ;;  %v3122_v3 = vld [vmem:[%s4087_s4 + $0x80] sm:$0xff]  ;;  %s3345_s20 = sshll.u32 %s3422_s18, 4  ;;  %s3346_s20 = int_to_ptr.vmem [resolvable:$false] %s3345_s20 }
  0x26   : > { %v3293_v4 = vld [vmem:[%s4085_s2 + $0x40] sm:$0xff]   ;;  %v3125_v5 = vld [vmem:[%s4087_s4 + $0x98] sm:$0xff]  ;;  %v3124_v6 = vld [vmem:[%s4087_s4 + $0x90] sm:$0xff]  ;;  %s3347_s19 = scalar_lea.vmem %s3346_s20, 512  ;;  %p3348_p1 = scmp.lt.s32.totalorder %s4038_s10, %s3346_s20 }
  0x27   : > { %971 = vperm.xlu1 %3280, %v338_v16   ;;  %v3127_v7 = vld [vmem:[%s4087_s4 + $0xa8] sm:$0xff]  ;;  %v3126_v8 = vld [vmem:[%s4087_s4 + $0xa0] sm:$0xff]  ;;  %v3129_v10 = vld [vmem:[%s4087_s4 + $0xb8] sm:$0xff]  ;;  %p3349_p2 = scmp.lt.s32.totalorder %s3347_s19, %s3341_s17 }
  0x28   : > { %966 = vperm.xlu0 %3279, %v337_v17   ;;  %v3294_v9 = vld [vmem:[%s4085_s2 + $0x48] sm:$0xff]   ;;  %v3128_v11 = vld [vmem:[%s4087_s4 + $0xb0] sm:$0xff]  ;;  %v3130_v13 = vld [vmem:[%s4087_s4 + $0xc0] sm:$0xff] }
  0x29   : > { %3059 = vmatmul.mubr.msk.bf16.gmra.mrb[4].mxu1 %vm486_vm1, %v3286_v18  ;;  %v3131_v12 = vld [vmem:[%s4087_s4 + $0xc8] sm:$0xff]  ;;  %v3295_v14 = vld [vmem:[%s4085_s2 + $0x50] sm:$0xff]   ;;  %v3133_v15 = vld [vmem:[%s4087_s4 + $0xd8] sm:$0xff]  ;;  %p3350_p3 = por %p3349_p2, %p3348_p1 }
  0x2a   : > { %3042 = vmatmul.mubr.msk.bf16.gmra.mrb[4].mxu0 %vm486_vm1, %v3286_v18  ;;  %793 = vmatprep.mubr.bf16.mxu1 %v3421_v0  ;;  %v3132_v16 = vld [vmem:[%s4087_s4 + $0xd0] sm:$0xff]  ;;  %v3135_v17 = vld [vmem:[%s4087_s4 + $0xe8] sm:$0xff]  ;;  %v3134_v18 = vld [vmem:[%s4087_s4 + $0xe0] sm:$0xff] }
  0x2b   : > { %600 = vmatprep.mubr.bf16.mxu0 %v3421_v0  ;;  %981 = vperm.xlu1 %3280, %v340_v19   ;;  %v3296_v19 = vld [vmem:[%s4085_s2 + $0x58] sm:$0xff]   ;;  %p3351_p5 = pnand %p3350_p3, %p3344_p0 }
  0x2c   : > { %976 = vperm.xlu0 %3279, %v339_v20   ;;  %v3137_v20 = vld [vmem:[%s4087_s4 + $0xf8] sm:$0xff] }
  0x2f   : > { %991 = vperm.xlu1 %3280, %v342_v21   ;;  %v3136_v21 = vld [vmem:[%s4087_s4 + $0xf0] sm:$0xff] }
  0x30   : > { %986 = vperm.xlu0 %3279, %v341_v22   ;;  %v2838_v22 = vld [vmem:[%s4089_s6] sm:$0xf] }
  0x31   : > { %3060 = vmatmul.mubr.msk.bf16.gmra.mrb[8].mxu1 %vm486_vm1, %v3287_v23 }
  0x32   : > { %3043 = vmatmul.mubr.msk.bf16.gmra.mrb[8].mxu0 %vm486_vm1, %v3287_v23  ;;  %803 = vmatprep.mubr.bf16.mxu1 %v3421_v0  ;;  %v3297_v23 = vld [vmem:[%s4085_s2 + $0x60] sm:$0xff]  }
  0x33   : > { %610 = vmatprep.mubr.bf16.mxu0 %v3421_v0  ;;  %1001 = vperm.xlu1 %3280, %v344_v24   ;;  %v3298_v24 = vld [vmem:[%s4085_s2 + $0x68] sm:$0xff]  }
  0x34   : > { %996 = vperm.xlu0 %3279, %v343_v25   ;;  %v3299_v25 = vld [vmem:[%s4085_s2 + $0x70] sm:$0xff]  }
  0x37   : > { %1011 = vperm.xlu1 %3280, %v346_v26   ;;  %v3300_v26 = vld [vmem:[%s4085_s2 + $0x78] sm:$0xff]  }
  0x38   : > { %1006 = vperm.xlu0 %3279, %v345_v27  }
  0x39   : > { %3061 = vmatmul.mubr.msk.bf16.gmra.mrb[12].mxu1 %vm486_vm1, %v3288_v28 }
  0x3a   : > { %3044 = vmatmul.mubr.msk.bf16.gmra.mrb[12].mxu0 %vm486_vm1, %v3288_v28  ;;  %813 = vmatprep.mubr.bf16.mxu1 %v3421_v0 }
  0x3b   : > { %620 = vmatprep.mubr.bf16.mxu0 %v3421_v0  ;;  %1213 = vperm.xlu1 %3280, %v1191_v29  }
  0x3c   : > { %1208 = vperm.xlu0 %3279, %v1190_v30  }
  0x3f   : > { %1223 = vperm.xlu1 %3280, %v1193_v31  }
  0x40   : > { %1218 = vperm.xlu0 %3279, %v1192_v32  }
  0x41   : > { %3062 = vmatmul.mubr.msk.bf16.gmra.mrb[16].mxu1 %vm486_vm1, %v3289_v33 }
  0x42   : > { %3045 = vmatmul.mubr.msk.bf16.gmra.mrb[16].mxu0 %vm486_vm1, %v3289_v33  ;;  %823 = vmatprep.mubr.bf16.mxu1 %v3421_v0 }
  0x43   : > { %630 = vmatprep.mubr.bf16.mxu0 %v3421_v0  ;;  %1233 = vperm.xlu1 %3280, %v1195_v34  }
  0x44   : > { %1228 = vperm.xlu0 %3279, %v1194_v35  }
  0x47   : > { %1243 = vperm.xlu1 %3280, %v1197_v36  }
  0x48   : > { %1238 = vperm.xlu0 %3279, %v1196_v37  }
  0x49   : > { %3063 = vmatmul.mubr.msk.bf16.gmra.mrb[20].mxu1 %vm486_vm1, %v3290_v38 }
  0x4a   : > { %3046 = vmatmul.mubr.msk.bf16.gmra.mrb[20].mxu0 %vm486_vm1, %v3290_v38  ;;  %833 = vmatprep.mubr.bf16.mxu1 %v3421_v0 }
  0x4b   : > { %640 = vmatprep.mubr.bf16.mxu0 %v3421_v0  ;;  %1253 = vperm.xlu1 %3280, %v1199_v39  }
  0x4c   : > { %1248 = vperm.xlu0 %3279, %v1198_v40  }
  0x4f   : > { %1263 = vperm.xlu1 %3280, %v1201_v41  }
  0x50   : > { %1258 = vperm.xlu0 %3279, %v1200_v42  }
  0x51   : > { %3064 = vmatmul.mubr.msk.bf16.gmra.mrb[24].mxu1 %vm486_vm1, %v3291_v43 }
  0x52   : > { %3047 = vmatmul.mubr.msk.bf16.gmra.mrb[24].mxu0 %vm486_vm1, %v3291_v43  ;;  %843 = vmatprep.mubr.bf16.mxu1 %v3421_v0 }
  0x53   : > { %650 = vmatprep.mubr.bf16.mxu0 %v3421_v0  ;;  %1273 = vperm.xlu1 %3280, %v1203_v44  }
  0x54   : > { %1268 = vperm.xlu0 %3279, %v1202_v45  }
  0x57   : > { %1283 = vperm.xlu1 %3280, %v1205_v46  }
  0x58   : > { %1278 = vperm.xlu0 %3279, %v1204_v47  }
  0x59   : > { %3065 = vmatmul.mubr.msk.bf16.gmra.mrb[28].mxu1 %vm486_vm1, %v3292_v48 }
  0x5a   : > { %3048 = vmatmul.mubr.msk.bf16.gmra.mrb[28].mxu0 %vm486_vm1, %v3292_v48  ;;  %853 = vmatprep.mubr.bf16.mxu1 %v3421_v0 }
  0x5b   : > { %660 = vmatprep.mubr.bf16.mxu0 %v3421_v0  ;;  %1954 = vperm.xlu1 %3280, %v3005_v49  }
  0x5c   : > { %1949 = vperm.xlu0 %3279, %v3004_v50  }
  0x5f   : > { %1964 = vperm.xlu1 %3280, %v3007_v51  }
  0x60   : > { %1959 = vperm.xlu0 %3279, %v3006_v52  }
  0x61   : > { %3066 = vmatmul.mubr.msk.bf16.gmra.mrb[32].mxu1 %vm486_vm1, %v3293_v4 }
  0x62   : > { %3049 = vmatmul.mubr.msk.bf16.gmra.mrb[32].mxu0 %vm486_vm1, %v3293_v4  ;;  %863 = vmatprep.mubr.bf16.mxu1 %v3421_v0 }
  0x63   : > { %1974 = vperm.xlu1 %3280, %v3009_v53   ;;  %670 = vmatprep.mubr.bf16.mxu0 %v3421_v0 }
  0x64   : > { %1969 = vperm.xlu0 %3279, %v3008_v54  }
  0x67   : > { %1984 = vperm.xlu1 %3280, %v3011_v55  }
  0x68   : > { %1979 = vperm.xlu0 %3279, %v3010_v56  }
  0x69   : > { %3067 = vmatmul.mubr.msk.bf16.gmra.mrb[36].mxu1 %vm486_vm1, %v3294_v9 }
  0x6a   : > { %3050 = vmatmul.mubr.msk.bf16.gmra.mrb[36].mxu0 %vm486_vm1, %v3294_v9  ;;  %873 = vmatprep.mubr.bf16.mxu1 %v3421_v0 }
  0x6b   : > { %1994 = vperm.xlu1 %3280, %v3013_v57   ;;  %680 = vmatprep.mubr.bf16.mxu0 %v3421_v0 }
  0x6c   : > { %1989 = vperm.xlu0 %3279, %v3012_v58  }
  0x6f   : > { %2004 = vperm.xlu1 %3280, %v3015_v59  }
  0x70   : > { %1999 = vperm.xlu0 %3279, %v3014_v60  }
  0x71   : > { %3068 = vmatmul.mubr.msk.bf16.gmra.mrb[40].mxu1 %vm486_vm1, %v3295_v14 }
  0x72   : > { %3051 = vmatmul.mubr.msk.bf16.gmra.mrb[40].mxu0 %vm486_vm1, %v3295_v14  ;;  %883 = vmatprep.mubr.bf16.mxu1 %v3421_v0 }
  0x73   : > { %2014 = vperm.xlu1 %3280, %v3017_v61   ;;  %690 = vmatprep.mubr.bf16.mxu0 %v3421_v0 }
  0x74   : > { %2009 = vperm.xlu0 %3279, %v3016_v62  }
  0x77   : > { %2024 = vperm.xlu1 %3280, %v3019_v63  }
  0x78   : > { %2019 = vperm.xlu0 %3279, %v3018_v1  }
  0x79   : > { %3069 = vmatmul.mubr.msk.bf16.gmra.mrb[44].mxu1 %vm486_vm1, %v3296_v19 }
  0x7a   : > { %3052 = vmatmul.mubr.msk.bf16.gmra.mrb[44].mxu0 %vm486_vm1, %v3296_v19  ;;  %893 = vmatprep.mubr.bf16.mxu1 %v3421_v0 }
  0x7b   : > { %2228 = vperm.xlu1 %3280, %v3123_v2   ;;  %700 = vmatprep.mubr.bf16.mxu0 %v3421_v0 }
  0x7c   : > { %2223 = vperm.xlu0 %3279, %v3122_v3  }
  0x7f   : > { %2238 = vperm.xlu1 %3280, %v3125_v5  }
  0x80   : > { %2233 = vperm.xlu0 %3279, %v3124_v6  }
  0x81   : > { %3070 = vmatmul.mubr.msk.bf16.gmra.mrb[48].mxu1 %vm486_vm1, %v3297_v23 }
  0x82   : > { %3053 = vmatmul.mubr.msk.bf16.gmra.mrb[48].mxu0 %vm486_vm1, %v3297_v23  ;;  %903 = vmatprep.mubr.bf16.mxu1 %v3421_v0 }
  0x83   : > { %2248 = vperm.xlu1 %3280, %v3127_v7   ;;  %710 = vmatprep.mubr.bf16.mxu0 %v3421_v0 }
  0x84   : > { %2243 = vperm.xlu0 %3279, %v3126_v8  }
  0x87   : > { %2258 = vperm.xlu1 %3280, %v3129_v10  }
  0x88   : > { %2253 = vperm.xlu0 %3279, %v3128_v11  }
  0x89   : > { %3071 = vmatmul.mubr.msk.bf16.gmra.mrb[52].mxu1 %vm486_vm1, %v3298_v24 }
  0x8a   : > { %3054 = vmatmul.mubr.msk.bf16.gmra.mrb[52].mxu0 %vm486_vm1, %v3298_v24  ;;  %913 = vmatprep.mubr.bf16.mxu1 %v3421_v0 }
  0x8b   : > { %2268 = vperm.xlu1 %3280, %v3131_v12   ;;  %720 = vmatprep.mubr.bf16.mxu0 %v3421_v0 }
  0x8c   : > { %2263 = vperm.xlu0 %3279, %v3130_v13  }
  0x8f   : > { %2278 = vperm.xlu1 %3280, %v3133_v15  }
  0x90   : > { %2273 = vperm.xlu0 %3279, %v3132_v16  }
  0x91   : > { %3072 = vmatmul.mubr.msk.bf16.gmra.mrb[56].mxu1 %vm486_vm1, %v3299_v25 }
  0x92   : > { %3055 = vmatmul.mubr.msk.bf16.gmra.mrb[56].mxu0 %vm486_vm1, %v3299_v25  ;;  %923 = vmatprep.mubr.bf16.mxu1 %v3421_v0 }
  0x93   : > { %2288 = vperm.xlu1 %3280, %v3135_v17   ;;  %730 = vmatprep.mubr.bf16.mxu0 %v3421_v0 }
  0x94   : > { %2283 = vperm.xlu0 %3279, %v3134_v18  }
  0x97   : > { %2298 = vperm.xlu1 %3280, %v3137_v20  }
  0x98   : > { %2293 = vperm.xlu0 %3279, %v3136_v21  }
  0x99   : > { %3073 = vmatmul.mubr.msk.bf16.gmra.mrb[60].mxu1 %vm486_vm1, %v3300_v26 }
  0x9a   : > { %3056 = vmatmul.mubr.msk.bf16.gmra.mrb[60].mxu0 %vm486_vm1, %v3300_v26  ;;  %1479 = vmatprep.mubr.bf16.mxu1 %v3421_v0  ;;  %v937_v27 = vpop.permute.xlu0 %936  ;;  %v947_v31 = vpop.permute.xlu1 %946 }
  0x9b   : > { %1366 = vmatprep.mubr.bf16.mxu0 %v3421_v0 }
  0x9c   : > { %2841 = vperm.xlu0 %3279, %v2838_v22  }
  0x9e   : > { %v952_v52 = vpop.permute.xlu1 %951 }
  0x9f   : > { %v942_v34 = vpop.permute.xlu0 %941 }
  0xa2   : > { %v962_v14 = vpop.permute.xlu1 %961 }
  0xa3   : > { %v957_v19 = vpop.permute.xlu0 %956 }
  0xf4   : > { %v775_v29 = vpop.f32.mrb[0].mxu1 }
  0xf5   : > { %v582_v28 = vpop.f32.mrb[0].mxu0  ;;  %v777_v33 = vpop.f32.mrb[1].mxu1  ;;  %v1016_v35 = vadd.f32 %v937_v27, %v775_v29 }
  0xf6   : > { %v584_v30 = vpop.f32.mrb[1].mxu0  ;;  %v1014_v32 = vadd.f32 %v937_v27, %v582_v28  ;;  %v1017_v38 = vadd.f32 %v937_v27, %v777_v33  ;;  %v779_v40 = vpop.f32.mrb[2].mxu1 }
  0xf7   : > { %v1015_v36 = vadd.f32 %v937_v27, %v584_v30  ;;  %v586_v37 = vpop.f32.mrb[2].mxu0  ;;  %v1020_v42 = vadd.f32 %v942_v34, %v779_v40  ;;  %v781_v44 = vpop.f32.mrb[3].mxu1  ;;  %v1080_v48 = vmax.f32 %v1016_v35, 0.0 }
  0xf8   : > { %v1018_v39 = vadd.f32 %v942_v34, %v586_v37  ;;  %v588_v41 = vpop.f32.mrb[3].mxu0  ;;  %v1078_v45 = vmax.f32 %v1014_v32, 0.0  ;;  %v1021_v47 = vadd.f32 %v942_v34, %v781_v44  ;;  %v1081_v53 = vmax.f32 %v1017_v38, 0.0  ;;  %v972_v44 = vpop.permute.xlu1 %971 }
  0xf9   : > { %v1019_v43 = vadd.f32 %v942_v34, %v588_v41  ;;  %v1079_v49 = vmax.f32 %v1015_v36, 0.0  ;;  %v1084_v50 = vmax.f32 %v1020_v42, 0.0 }
  0xfa   : > { %v1082_v46 = vmax.f32 %v1018_v39, 0.0  ;;  %v1085_v55 = vmax.f32 %v1021_v47, 0.0 }
  0xfb   : > { %v1083_v51 = vmax.f32 %v1019_v43, 0.0  ;;  %v1160_v57 = vpack.c.bf16 %v1084_v50, %v1080_v48 }
  0xfc   : > { %v1158_v54 = vpack.c.bf16 %v1082_v46, %v1078_v45  ;;  %v785_v59 = vpop.f32.mrb[4].mxu1  ;;  %v1161_v61 = vpack.c.bf16 %v1085_v55, %v1081_v53 }
  0xfd   : > { %v592_v56 = vpop.f32.mrb[4].mxu0  ;;  %v1159_v58 = vpack.c.bf16 %v1083_v51, %v1079_v49  ;;  %v787_v63 = vpop.f32.mrb[5].mxu1  ;;  %v1024_v1 = vadd.f32 %v947_v31, %v785_v59 }
  0xfe   : > { %v594_v60 = vpop.f32.mrb[5].mxu0  ;;  %v1022_v62 = vadd.f32 %v947_v31, %v592_v56  ;;  %1447 = vmatprep.subr.bf16.mxu1 %v1161_v61  ;;  %v1025_v4 = vadd.f32 %v947_v31, %v787_v63  ;;  %v789_v6 = vpop.f32.mrb[6].mxu1 }
  0xff   : > { %1334 = vmatprep.subr.bf16.mxu0 %v1159_v58  ;;  %v1023_v2 = vadd.f32 %v947_v31, %v594_v60  ;;  %v596_v3 = vpop.f32.mrb[6].mxu0  ;;  %1448 = vmatpush1.bf16.msra.mxu1 %v1160_v57  ;;  %v1028_v8 = vadd.f32 %v952_v52, %v789_v6  ;;  %v791_v10 = vpop.f32.mrb[7].mxu1  ;;  %v1088_v15 = vmax.f32 %v1024_v1, 0.0 }
 0x100   : > { %1335 = vmatpush1.bf16.msra.mxu0 %v1158_v54  ;;  %v1026_v5 = vadd.f32 %v952_v52, %v596_v3  ;;  %v598_v7 = vpop.f32.mrb[7].mxu0  ;;  %v1086_v11 = vmax.f32 %v1022_v62, 0.0  ;;  %v1029_v13 = vadd.f32 %v952_v52, %v791_v10  ;;  %v1089_v20 = vmax.f32 %v1025_v4, 0.0  ;;  %v967_v49 = vpop.permute.xlu0 %966 }
 0x101   : > { %v1027_v9 = vadd.f32 %v952_v52, %v598_v7  ;;  %v1087_v16 = vmax.f32 %v1023_v2, 0.0  ;;  %v1092_v17 = vmax.f32 %v1028_v8, 0.0 }
 0x102   : > { %v1090_v12 = vmax.f32 %v1026_v5, 0.0  ;;  %v1093_v22 = vmax.f32 %v1029_v13, 0.0 }
 0x103   : > { %v1091_v18 = vmax.f32 %v1027_v9, 0.0  ;;  %v1164_v24 = vpack.c.bf16 %v1092_v17, %v1088_v15 }
 0x104   : > { %v1162_v21 = vpack.c.bf16 %v1090_v12, %v1086_v11  ;;  %v795_v26 = vpop.f32.mrb[8].mxu1  ;;  %v1165_v28 = vpack.c.bf16 %v1093_v22, %v1089_v20  ;;  %v982_v11 = vpop.permute.xlu1 %981 }
 0x105   : > { %v602_v23 = vpop.f32.mrb[8].mxu0  ;;  %v1163_v25 = vpack.c.bf16 %v1091_v18, %v1087_v16  ;;  %v797_v30 = vpop.f32.mrb[9].mxu1  ;;  %v1032_v31 = vadd.f32 %v957_v19, %v795_v26 }
 0x106   : > { %v604_v27 = vpop.f32.mrb[9].mxu0  ;;  %v1030_v29 = vadd.f32 %v957_v19, %v602_v23  ;;  %v1033_v34 = vadd.f32 %v957_v19, %v797_v30  ;;  %v799_v36 = vpop.f32.mrb[10].mxu1  ;;  %1449 = vmatprep.subr.bf16.mxu1 %v1165_v28 }
 0x107   : > { %v1031_v32 = vadd.f32 %v957_v19, %v604_v27  ;;  %v606_v33 = vpop.f32.mrb[10].mxu0  ;;  %1336 = vmatprep.subr.bf16.mxu0 %v1163_v25  ;;  %v1036_v38 = vadd.f32 %v962_v14, %v799_v36  ;;  %v801_v40 = vpop.f32.mrb[11].mxu1  ;;  %1450 = vmatpush1.bf16.msra.mxu1 %v1164_v24  ;;  %v1096_v45 = vmax.f32 %v1032_v31, 0.0 }
 0x108   : > { %v1034_v35 = vadd.f32 %v962_v14, %v606_v33  ;;  %v608_v37 = vpop.f32.mrb[11].mxu0  ;;  %1337 = vmatpush1.bf16.msra.mxu0 %v1162_v21  ;;  %v1094_v41 = vmax.f32 %v1030_v29, 0.0  ;;  %v1037_v43 = vadd.f32 %v962_v14, %v801_v40  ;;  %v1097_v50 = vmax.f32 %v1033_v34, 0.0  ;;  %v977_v16 = vpop.permute.xlu0 %976 }
 0x109   : > { %v1035_v39 = vadd.f32 %v962_v14, %v608_v37  ;;  %v1095_v46 = vmax.f32 %v1031_v32, 0.0  ;;  %v1100_v47 = vmax.f32 %v1036_v38, 0.0 }
 0x10a   : > { %v1098_v42 = vmax.f32 %v1034_v35, 0.0  ;;  %v1101_v52 = vmax.f32 %v1037_v43, 0.0 }
 0x10b   : > { %v1099_v48 = vmax.f32 %v1035_v39, 0.0  ;;  %v1168_v54 = vpack.c.bf16 %v1100_v47, %v1096_v45 }
 0x10c   : > { %v1166_v51 = vpack.c.bf16 %v1098_v42, %v1094_v41  ;;  %v805_v56 = vpop.f32.mrb[12].mxu1  ;;  %v1169_v58 = vpack.c.bf16 %v1101_v52, %v1097_v50  ;;  %v992_v41 = vpop.permute.xlu1 %991 }
 0x10d   : > { %v612_v53 = vpop.f32.mrb[12].mxu0  ;;  %v1167_v55 = vpack.c.bf16 %v1099_v48, %v1095_v46  ;;  %v807_v60 = vpop.f32.mrb[13].mxu1  ;;  %v1040_v61 = vadd.f32 %v967_v49, %v805_v56 }
 0x10e   : > { %v614_v57 = vpop.f32.mrb[13].mxu0  ;;  %v1038_v59 = vadd.f32 %v967_v49, %v612_v53  ;;  %v1041_v1 = vadd.f32 %v967_v49, %v807_v60  ;;  %v809_v3 = vpop.f32.mrb[14].mxu1  ;;  %1451 = vmatprep.subr.bf16.mxu1 %v1169_v58 }
 0x10f   : > { %v1039_v62 = vadd.f32 %v967_v49, %v614_v57  ;;  %v616_v63 = vpop.f32.mrb[14].mxu0  ;;  %1338 = vmatprep.subr.bf16.mxu0 %v1167_v55  ;;  %v1044_v5 = vadd.f32 %v972_v44, %v809_v3  ;;  %v811_v7 = vpop.f32.mrb[15].mxu1  ;;  %1452 = vmatpush1.bf16.msra.mxu1 %v1168_v54  ;;  %v1104_v12 = vmax.f32 %v1040_v61, 0.0 }
 0x110   : > { %v1042_v2 = vadd.f32 %v972_v44, %v616_v63  ;;  %v618_v4 = vpop.f32.mrb[15].mxu0  ;;  %1339 = vmatpush1.bf16.msra.mxu0 %v1166_v51  ;;  %v1102_v8 = vmax.f32 %v1038_v59, 0.0  ;;  %v1045_v10 = vadd.f32 %v972_v44, %v811_v7  ;;  %v1105_v17 = vmax.f32 %v1041_v1, 0.0  ;;  %v987_v46 = vpop.permute.xlu0 %986 }
 0x111   : > { %v1043_v6 = vadd.f32 %v972_v44, %v618_v4  ;;  %v1103_v13 = vmax.f32 %v1039_v62, 0.0  ;;  %v1108_v14 = vmax.f32 %v1044_v5, 0.0 }
 0x112   : > { %v1106_v9 = vmax.f32 %v1042_v2, 0.0  ;;  %v1109_v19 = vmax.f32 %v1045_v10, 0.0 }
 0x113   : > { %v1107_v15 = vmax.f32 %v1043_v6, 0.0  ;;  %v1172_v21 = vpack.c.bf16 %v1108_v14, %v1104_v12  ;;  %v1002_v12 = vpop.permute.xlu1 %1001 }
 0x114   : > { %v1170_v18 = vpack.c.bf16 %v1106_v9, %v1102_v8  ;;  %v815_v23 = vpop.f32.mrb[16].mxu1  ;;  %v1173_v25 = vpack.c.bf16 %v1109_v19, %v1105_v17 }
 0x115   : > { %v622_v20 = vpop.f32.mrb[16].mxu0  ;;  %v1171_v22 = vpack.c.bf16 %v1107_v15, %v1103_v13  ;;  %v817_v27 = vpop.f32.mrb[17].mxu1  ;;  %v1048_v28 = vadd.f32 %v977_v16, %v815_v23 }
 0x116   : > { %v624_v24 = vpop.f32.mrb[17].mxu0  ;;  %v1046_v26 = vadd.f32 %v977_v16, %v622_v20  ;;  %v1049_v31 = vadd.f32 %v977_v16, %v817_v27  ;;  %v819_v33 = vpop.f32.mrb[18].mxu1  ;;  %1453 = vmatprep.subr.bf16.mxu1 %v1173_v25 }
 0x117   : > { %v1047_v29 = vadd.f32 %v977_v16, %v624_v24  ;;  %v626_v30 = vpop.f32.mrb[18].mxu0  ;;  %1340 = vmatprep.subr.bf16.mxu0 %v1171_v22  ;;  %v1052_v35 = vadd.f32 %v982_v11, %v819_v33  ;;  %v821_v37 = vpop.f32.mrb[19].mxu1  ;;  %1454 = vmatpush1.bf16.msra.mxu1 %v1172_v21  ;;  %v1112_v42 = vmax.f32 %v1048_v28, 0.0 }
 0x118   : > { %v1050_v32 = vadd.f32 %v982_v11, %v626_v30  ;;  %v628_v34 = vpop.f32.mrb[19].mxu0  ;;  %1341 = vmatpush1.bf16.msra.mxu0 %v1170_v18  ;;  %v1110_v38 = vmax.f32 %v1046_v26, 0.0  ;;  %v1053_v40 = vadd.f32 %v982_v11, %v821_v37  ;;  %v1113_v47 = vmax.f32 %v1049_v31, 0.0  ;;  %v997_v16 = vpop.permute.xlu0 %996 }
 0x119   : > { %v1051_v36 = vadd.f32 %v982_v11, %v628_v34  ;;  %v1111_v43 = vmax.f32 %v1047_v29, 0.0  ;;  %v1116_v44 = vmax.f32 %v1052_v35, 0.0 }
 0x11a   : > { %v1114_v39 = vmax.f32 %v1050_v32, 0.0  ;;  %v1117_v49 = vmax.f32 %v1053_v40, 0.0 }
 0x11b   : > { %v1115_v45 = vmax.f32 %v1051_v36, 0.0  ;;  %v1176_v51 = vpack.c.bf16 %v1116_v44, %v1112_v42  ;;  %v1012_v42 = vpop.permute.xlu1 %1011 }
 0x11c   : > { %v1174_v48 = vpack.c.bf16 %v1114_v39, %v1110_v38  ;;  %v825_v54 = vpop.f32.mrb[20].mxu1  ;;  %v1177_v56 = vpack.c.bf16 %v1117_v49, %v1113_v47 }
 0x11d   : > { %v632_v50 = vpop.f32.mrb[20].mxu0  ;;  %v1175_v52 = vpack.c.bf16 %v1115_v45, %v1111_v43  ;;  %v1056_v57 = vadd.f32 %v987_v46, %v825_v54  ;;  %v827_v59 = vpop.f32.mrb[21].mxu1 }
 0x11e   : > { %v1054_v53 = vadd.f32 %v987_v46, %v632_v50  ;;  %v634_v55 = vpop.f32.mrb[21].mxu0  ;;  %v1057_v61 = vadd.f32 %v987_v46, %v827_v59  ;;  %v829_v63 = vpop.f32.mrb[22].mxu1  ;;  %1455 = vmatprep.subr.bf16.mxu1 %v1177_v56 }
 0x11f   : > { %v1055_v58 = vadd.f32 %v987_v46, %v634_v55  ;;  %v636_v60 = vpop.f32.mrb[22].mxu0  ;;  %1342 = vmatprep.subr.bf16.mxu0 %v1175_v52  ;;  %v1060_v2 = vadd.f32 %v992_v41, %v829_v63  ;;  %v831_v4 = vpop.f32.mrb[23].mxu1  ;;  %1456 = vmatpush1.bf16.msra.mxu1 %v1176_v51  ;;  %v1120_v8 = vmax.f32 %v1056_v57, 0.0 }
 0x120   : > { %v1058_v62 = vadd.f32 %v992_v41, %v636_v60  ;;  %v638_v1 = vpop.f32.mrb[23].mxu0  ;;  %1343 = vmatpush1.bf16.msra.mxu0 %v1174_v48  ;;  %v1118_v5 = vmax.f32 %v1054_v53, 0.0  ;;  %v1061_v7 = vadd.f32 %v992_v41, %v831_v4  ;;  %v1121_v13 = vmax.f32 %v1057_v61, 0.0  ;;  %v1007_v46 = vpop.permute.xlu0 %1006 }
 0x121   : > { %v1059_v3 = vadd.f32 %v992_v41, %v638_v1  ;;  %v1119_v9 = vmax.f32 %v1055_v58, 0.0  ;;  %v1124_v10 = vmax.f32 %v1060_v2, 0.0 }
 0x122   : > { %v1122_v6 = vmax.f32 %v1058_v62, 0.0  ;;  %v1125_v15 = vmax.f32 %v1061_v7, 0.0 }
 0x123   : > { %v1123_v11 = vmax.f32 %v1059_v3, 0.0  ;;  %v1180_v17 = vpack.c.bf16 %v1124_v10, %v1120_v8 }
 0x124   : > { %v1178_v14 = vpack.c.bf16 %v1122_v6, %v1118_v5  ;;  %v1181_v20 = vpack.c.bf16 %v1125_v15, %v1121_v13  ;;  %v835_v22 = vpop.f32.mrb[24].mxu1  ;;  %v3301_v15 = vld [vmem:[%s4086_s3] sm:$0xff]  }
 0x125   : > { %v1179_v18 = vpack.c.bf16 %v1123_v11, %v1119_v9  ;;  %v642_v19 = vpop.f32.mrb[24].mxu0  ;;  %v1064_v24 = vadd.f32 %v997_v16, %v835_v22  ;;  %v837_v26 = vpop.f32.mrb[25].mxu1  ;;  %v3308_v22 = vld [vmem:[%s4086_s3 + $0x38] sm:$0xff]  }
 0x126   : > { %v1062_v21 = vadd.f32 %v997_v16, %v642_v19  ;;  %v644_v23 = vpop.f32.mrb[25].mxu0  ;;  %v1065_v28 = vadd.f32 %v997_v16, %v837_v26  ;;  %v839_v30 = vpop.f32.mrb[26].mxu1  ;;  %1457 = vmatprep.subr.bf16.mxu1 %v1181_v20  ;;  %v3305_v19 = vld [vmem:[%s4086_s3 + $0x20] sm:$0xff]   ;;  %v3306_v20 = vld [vmem:[%s4086_s3 + $0x28] sm:$0xff]  }
 0x127   : > { %v1063_v25 = vadd.f32 %v997_v16, %v644_v23  ;;  %v646_v27 = vpop.f32.mrb[26].mxu0  ;;  %1344 = vmatprep.subr.bf16.mxu0 %v1179_v18  ;;  %v1068_v32 = vadd.f32 %v1002_v12, %v839_v30  ;;  %v841_v34 = vpop.f32.mrb[27].mxu1  ;;  %1458 = vmatpush1.bf16.msra.mxu1 %v1180_v17  ;;  %v1128_v38 = vmax.f32 %v1064_v24, 0.0  ;;  %v3302_v16 = vld [vmem:[%s4086_s3 + $0x8] sm:$0xff]   ;;  %v3303_v17 = vld [vmem:[%s4086_s3 + $0x10] sm:$0xff]   ;;  %v3304_v18 = vld [vmem:[%s4086_s3 + $0x18] sm:$0xff]  }
 0x128   : > { %v1066_v29 = vadd.f32 %v1002_v12, %v646_v27  ;;  %v648_v31 = vpop.f32.mrb[27].mxu0  ;;  %1345 = vmatpush1.bf16.msra.mxu0 %v1178_v14  ;;  %v1126_v35 = vmax.f32 %v1062_v21, 0.0  ;;  %v1069_v37 = vadd.f32 %v1002_v12, %v841_v34  ;;  %v1129_v43 = vmax.f32 %v1065_v28, 0.0  ;;  %v3307_v21 = vld [vmem:[%s4086_s3 + $0x30] sm:$0xff]   ;;  %v1214_v23 = vpop.permute.xlu1 %1213 }
 0x129   : > { %v1067_v33 = vadd.f32 %v1002_v12, %v648_v31  ;;  %v1127_v39 = vmax.f32 %v1063_v25, 0.0  ;;  %v1132_v40 = vmax.f32 %v1068_v32, 0.0  ;;  %v1209_v24 = vpop.permute.xlu0 %1208 }
 0x12a   : > { %v1130_v36 = vmax.f32 %v1066_v29, 0.0  ;;  %v1133_v45 = vmax.f32 %v1069_v37, 0.0 }
 0x12b   : > { %v1131_v41 = vmax.f32 %v1067_v33, 0.0  ;;  %v1184_v47 = vpack.c.bf16 %v1132_v40, %v1128_v38 }
 0x12c   : > { %v1182_v44 = vpack.c.bf16 %v1130_v36, %v1126_v35  ;;  %v1185_v50 = vpack.c.bf16 %v1133_v45, %v1129_v43  ;;  %v845_v52 = vpop.f32.mrb[28].mxu1 }
 0x12d   : > { %v1183_v48 = vpack.c.bf16 %v1131_v41, %v1127_v39  ;;  %v652_v49 = vpop.f32.mrb[28].mxu0  ;;  %v1072_v54 = vadd.f32 %v1007_v46, %v845_v52  ;;  %v847_v56 = vpop.f32.mrb[29].mxu1 }
 0x12e   : > { %v1070_v51 = vadd.f32 %v1007_v46, %v652_v49  ;;  %v654_v53 = vpop.f32.mrb[29].mxu0  ;;  %v1073_v58 = vadd.f32 %v1007_v46, %v847_v56  ;;  %v849_v60 = vpop.f32.mrb[30].mxu1  ;;  %1459 = vmatprep.subr.bf16.mxu1 %v1185_v50 }
 0x12f   : > { %v1071_v55 = vadd.f32 %v1007_v46, %v654_v53  ;;  %v656_v57 = vpop.f32.mrb[30].mxu0  ;;  %1346 = vmatprep.subr.bf16.mxu0 %v1183_v48  ;;  %v1076_v62 = vadd.f32 %v1012_v42, %v849_v60  ;;  %v851_v1 = vpop.f32.mrb[31].mxu1  ;;  %1460 = vmatpush1.bf16.msra.mxu1 %v1184_v47  ;;  %v1136_v5 = vmax.f32 %v1072_v54, 0.0 }
 0x130   : > { %v1074_v59 = vadd.f32 %v1012_v42, %v656_v57  ;;  %v658_v61 = vpop.f32.mrb[31].mxu0  ;;  %1347 = vmatpush1.bf16.msra.mxu0 %v1182_v44  ;;  %v1134_v2 = vmax.f32 %v1070_v51, 0.0  ;;  %v1077_v4 = vadd.f32 %v1012_v42, %v851_v1  ;;  %v1137_v9 = vmax.f32 %v1073_v58, 0.0  ;;  %v1224_v47 = vpop.permute.xlu1 %1223 }
 0x131   : > { %v1075_v63 = vadd.f32 %v1012_v42, %v658_v61  ;;  %v1135_v6 = vmax.f32 %v1071_v55, 0.0  ;;  %v1140_v7 = vmax.f32 %v1076_v62, 0.0  ;;  %v1219_v51 = vpop.permute.xlu0 %1218 }
 0x132   : > { %v1138_v3 = vmax.f32 %v1074_v59, 0.0  ;;  %v1141_v11 = vmax.f32 %v1077_v4, 0.0 }
 0x133   : > { %v1139_v8 = vmax.f32 %v1075_v63, 0.0  ;;  %v1188_v12 = vpack.c.bf16 %v1140_v7, %v1136_v5 }
 0x134   : > { %v1186_v10 = vpack.c.bf16 %v1138_v3, %v1134_v2  ;;  %v1189_v14 = vpack.c.bf16 %v1141_v11, %v1137_v9 }
 0x135   : > { %v1187_v13 = vpack.c.bf16 %v1139_v8, %v1135_v6 }
 0x136   : > { %1461 = vmatprep.subr.bf16.mxu1 %v1189_v14  ;;  %v1234_v14 = vpop.permute.xlu1 %1233 }
 0x137   : > { %1348 = vmatprep.subr.bf16.mxu0 %v1187_v13  ;;  %1462 = vmatpush1.bf16.msra.mxu1 %v1188_v12 }
 0x138   : > { %1349 = vmatpush1.bf16.msra.mxu0 %v1186_v10 }
 0x13a   : > { %1480 = vmatmul.mubr.bf16.vlgmr.msra.gmra.mrb[64].mxu1 %v3301_v15 }
 0x13b   : > { %1367 = vmatmul.mubr.bf16.vlgmr.msra.gmra.mrb[64].mxu0 %v3301_v15  ;;  %1489 = vmatprep.mubr.bf16.mxu1 %v3421_v0 }
 0x13c   : > { %1376 = vmatprep.mubr.bf16.mxu0 %v3421_v0 }
 0x142   : > { %1490 = vmatmul.mubr.bf16.gmra.mrb[68].mxu1 %v3302_v16 }
 0x143   : > { %1377 = vmatmul.mubr.bf16.gmra.mrb[68].mxu0 %v3302_v16  ;;  %1499 = vmatprep.mubr.bf16.mxu1 %v3421_v0 }
 0x144   : > { %1386 = vmatprep.mubr.bf16.mxu0 %v3421_v0 }
 0x14a   : > { %1500 = vmatmul.mubr.bf16.gmra.mrb[72].mxu1 %v3303_v17 }
 0x14b   : > { %1387 = vmatmul.mubr.bf16.gmra.mrb[72].mxu0 %v3303_v17  ;;  %1509 = vmatprep.mubr.bf16.mxu1 %v3421_v0 }
 0x14c   : > { %1396 = vmatprep.mubr.bf16.mxu0 %v3421_v0 }
 0x152   : > { %1510 = vmatmul.mubr.bf16.gmra.mrb[76].mxu1 %v3304_v18 }
 0x153   : > { %1397 = vmatmul.mubr.bf16.gmra.mrb[76].mxu0 %v3304_v18  ;;  %1519 = vmatprep.mubr.bf16.mxu1 %v3421_v0  ;;  %v1229_v18 = vpop.permute.xlu0 %1228 }
 0x154   : > { %1406 = vmatprep.mubr.bf16.mxu0 %v3421_v0 }
 0x15a   : > { %1520 = vmatmul.mubr.bf16.gmra.mrb[80].mxu1 %v3305_v19 }
 0x15b   : > { %1407 = vmatmul.mubr.bf16.gmra.mrb[80].mxu0 %v3305_v19  ;;  %1529 = vmatprep.mubr.bf16.mxu1 %v3421_v0 }
 0x15c   : > { %1416 = vmatprep.mubr.bf16.mxu0 %v3421_v0 }
 0x162   : > { %1530 = vmatmul.mubr.bf16.gmra.mrb[84].mxu1 %v3306_v20 }
 0x163   : > { %1417 = vmatmul.mubr.bf16.gmra.mrb[84].mxu0 %v3306_v20  ;;  %1539 = vmatprep.mubr.bf16.mxu1 %v3421_v0 }
 0x164   : > { %1426 = vmatprep.mubr.bf16.mxu0 %v3421_v0 }
 0x16a   : > { %1540 = vmatmul.mubr.bf16.gmra.mrb[88].mxu1 %v3307_v21 }
 0x16b   : > { %1427 = vmatmul.mubr.bf16.gmra.mrb[88].mxu0 %v3307_v21  ;;  %1549 = vmatprep.mubr.bf16.mxu1 %v3421_v0 }
 0x16c   : > { %1436 = vmatprep.mubr.bf16.mxu0 %v3421_v0 }
 0x172   : > { %1550 = vmatmul.mubr.bf16.gmra.mrb[92].mxu1 %v3308_v22 }
 0x173   : > { %1437 = vmatmul.mubr.bf16.gmra.mrb[92].mxu0 %v3308_v22  ;;  %1866 = vmatprep.mubr.bf16.mxu1 %v3421_v0 }
 0x174   : > { %1753 = vmatprep.mubr.bf16.mxu0 %v3421_v0 }
 0x20d   : > { %v1481_v27 = vpop.f32.mrb[64].mxu1 }
 0x20e   : > { %v1368_v25 = vpop.f32.mrb[64].mxu0  ;;  %v1482_v29 = vadd.f32 %v1481_v27, %v1209_v24  ;;  %v1483_v31 = vpop.f32.mrb[65].mxu1 }
 0x20f   : > { %v1369_v26 = vadd.f32 %v1368_v25, %v1209_v24  ;;  %v1370_v28 = vpop.f32.mrb[65].mxu0  ;;  %v1484_v33 = vadd.f32 %v1483_v31, %v1209_v24  ;;  %v1485_v35 = vpop.f32.mrb[66].mxu1 }
 0x210   : > { %v1371_v30 = vadd.f32 %v1370_v28, %v1209_v24  ;;  %v1372_v32 = vpop.f32.mrb[66].mxu0  ;;  %v1486_v37 = vadd.f32 %v1485_v35, %v1214_v23  ;;  %v1487_v39 = vpop.f32.mrb[67].mxu1  ;;  %v1562_v43 = vmax.f32 %v1482_v29, 0.0 }
 0x211   : > { %v1373_v34 = vadd.f32 %v1372_v32, %v1214_v23  ;;  %v1374_v36 = vpop.f32.mrb[67].mxu0  ;;  %v1560_v40 = vmax.f32 %v1369_v26, 0.0  ;;  %v1488_v42 = vadd.f32 %v1487_v39, %v1214_v23  ;;  %v1563_v48 = vmax.f32 %v1484_v33, 0.0 }
 0x212   : > { %v1375_v38 = vadd.f32 %v1374_v36, %v1214_v23  ;;  %v1561_v44 = vmax.f32 %v1371_v30, 0.0  ;;  %v1566_v45 = vmax.f32 %v1486_v37, 0.0 }
 0x213   : > { %v1564_v41 = vmax.f32 %v1373_v34, 0.0  ;;  %v1567_v50 = vmax.f32 %v1488_v42, 0.0 }
 0x214   : > { %v1565_v46 = vmax.f32 %v1375_v38, 0.0  ;;  %v3817_v52 = vpack.c.bf16 %v1566_v45, %v1562_v43 }
 0x215   : > { %v3815_v49 = vpack.c.bf16 %v1564_v41, %v1560_v40  ;;  %v3821_v55 = vpack.c.bf16 %v1567_v50, %v1563_v48  ;;  %v1491_v57 = vpop.f32.mrb[68].mxu1  ;;  %v1239_v48 = vpop.permute.xlu0 %1238 }
 0x216   : > { %v3819_v53 = vpack.c.bf16 %v1565_v46, %v1561_v44  ;;  %v1378_v54 = vpop.f32.mrb[68].mxu0  ;;  %v1492_v59 = vadd.f32 %v1491_v57, %v1219_v51  ;;  %v1493_v61 = vpop.f32.mrb[69].mxu1 }
 0x217   : > { %v1379_v56 = vadd.f32 %v1378_v54, %v1219_v51  ;;  %v1380_v58 = vpop.f32.mrb[69].mxu0  ;;  %v1494_v63 = vadd.f32 %v1493_v61, %v1219_v51  ;;  %v1495_v2 = vpop.f32.mrb[70].mxu1  ;;  %1834 = vmatprep.subr.bf16.mxu1 %v3821_v55 }
 0x218   : > { %v1381_v60 = vadd.f32 %v1380_v58, %v1219_v51  ;;  %v1382_v62 = vpop.f32.mrb[70].mxu0  ;;  %1721 = vmatprep.subr.bf16.mxu0 %v3819_v53  ;;  %v1496_v4 = vadd.f32 %v1495_v2, %v1224_v47  ;;  %v1497_v6 = vpop.f32.mrb[71].mxu1  ;;  %1835 = vmatpush1.bf16.msra.mxu1 %v3817_v52  ;;  %v1570_v10 = vmax.f32 %v1492_v59, 0.0 }
 0x219   : > { %v1383_v1 = vadd.f32 %v1382_v62, %v1224_v47  ;;  %v1384_v3 = vpop.f32.mrb[71].mxu0  ;;  %1722 = vmatpush1.bf16.msra.mxu0 %v3815_v49  ;;  %v1568_v7 = vmax.f32 %v1379_v56, 0.0  ;;  %v1498_v9 = vadd.f32 %v1497_v6, %v1224_v47  ;;  %v1571_v15 = vmax.f32 %v1494_v63, 0.0  ;;  %v1244_v44 = vpop.permute.xlu1 %1243 }
 0x21a   : > { %v1385_v5 = vadd.f32 %v1384_v3, %v1224_v47  ;;  %v1569_v11 = vmax.f32 %v1381_v60, 0.0  ;;  %v1574_v12 = vmax.f32 %v1496_v4, 0.0 }
 0x21b   : > { %v1572_v8 = vmax.f32 %v1383_v1, 0.0  ;;  %v1575_v17 = vmax.f32 %v1498_v9, 0.0 }
 0x21c   : > { %v1573_v13 = vmax.f32 %v1385_v5, 0.0  ;;  %v3829_v19 = vpack.c.bf16 %v1574_v12, %v1570_v10 }
 0x21d   : > { %v3827_v16 = vpack.c.bf16 %v1572_v8, %v1568_v7  ;;  %v3833_v22 = vpack.c.bf16 %v1575_v17, %v1571_v15  ;;  %v1501_v24 = vpop.f32.mrb[72].mxu1  ;;  %v1254_v15 = vpop.permute.xlu1 %1253 }
 0x21e   : > { %v3831_v20 = vpack.c.bf16 %v1573_v13, %v1569_v11  ;;  %v1388_v21 = vpop.f32.mrb[72].mxu0  ;;  %v1502_v26 = vadd.f32 %v1501_v24, %v1229_v18  ;;  %v1503_v28 = vpop.f32.mrb[73].mxu1 }
 0x21f   : > { %v1389_v23 = vadd.f32 %v1388_v21, %v1229_v18  ;;  %v1390_v25 = vpop.f32.mrb[73].mxu0  ;;  %v1504_v30 = vadd.f32 %v1503_v28, %v1229_v18  ;;  %v1505_v32 = vpop.f32.mrb[74].mxu1  ;;  %1836 = vmatprep.subr.bf16.mxu1 %v3833_v22 }
 0x220   : > { %v1391_v27 = vadd.f32 %v1390_v25, %v1229_v18  ;;  %v1392_v29 = vpop.f32.mrb[74].mxu0  ;;  %1723 = vmatprep.subr.bf16.mxu0 %v3831_v20  ;;  %v1506_v34 = vadd.f32 %v1505_v32, %v1234_v14  ;;  %v1507_v36 = vpop.f32.mrb[75].mxu1  ;;  %1837 = vmatpush1.bf16.msra.mxu1 %v3829_v19  ;;  %v1578_v40 = vmax.f32 %v1502_v26, 0.0 }
 0x221   : > { %v1393_v31 = vadd.f32 %v1392_v29, %v1234_v14  ;;  %v1394_v33 = vpop.f32.mrb[75].mxu0  ;;  %1724 = vmatpush1.bf16.msra.mxu0 %v3827_v16  ;;  %v1576_v37 = vmax.f32 %v1389_v23, 0.0  ;;  %v1508_v39 = vadd.f32 %v1507_v36, %v1234_v14  ;;  %v1579_v45 = vmax.f32 %v1504_v30, 0.0  ;;  %v1249_v23 = vpop.permute.xlu0 %1248 }
 0x222   : > { %v1395_v35 = vadd.f32 %v1394_v33, %v1234_v14  ;;  %v1577_v41 = vmax.f32 %v1391_v27, 0.0  ;;  %v1582_v42 = vmax.f32 %v1506_v34, 0.0 }
 0x223   : > { %v1580_v38 = vmax.f32 %v1393_v31, 0.0  ;;  %v1583_v47 = vmax.f32 %v1508_v39, 0.0 }
 0x224   : > { %v1581_v43 = vmax.f32 %v1395_v35, 0.0  ;;  %v3841_v50 = vpack.c.bf16 %v1582_v42, %v1578_v40 }
 0x225   : > { %v3839_v46 = vpack.c.bf16 %v1580_v38, %v1576_v37  ;;  %v3845_v56 = vpack.c.bf16 %v1583_v47, %v1579_v45  ;;  %v1511_v58 = vpop.f32.mrb[76].mxu1 }
 0x226   : > { %v3843_v51 = vpack.c.bf16 %v1581_v43, %v1577_v41  ;;  %v1398_v54 = vpop.f32.mrb[76].mxu0  ;;  %v1512_v60 = vadd.f32 %v1511_v58, %v1239_v48  ;;  %v1513_v62 = vpop.f32.mrb[77].mxu1 }
 0x227   : > { %v1399_v57 = vadd.f32 %v1398_v54, %v1239_v48  ;;  %v1400_v59 = vpop.f32.mrb[77].mxu0  ;;  %v1514_v1 = vadd.f32 %v1513_v62, %v1239_v48  ;;  %v1515_v3 = vpop.f32.mrb[78].mxu1  ;;  %1838 = vmatprep.subr.bf16.mxu1 %v3845_v56 }
 0x228   : > { %v1401_v61 = vadd.f32 %v1400_v59, %v1239_v48  ;;  %v1402_v63 = vpop.f32.mrb[78].mxu0  ;;  %1725 = vmatprep.subr.bf16.mxu0 %v3843_v51  ;;  %v1516_v5 = vadd.f32 %v1515_v3, %v1244_v44  ;;  %v1517_v7 = vpop.f32.mrb[79].mxu1  ;;  %1839 = vmatpush1.bf16.msra.mxu1 %v3841_v50  ;;  %v1586_v11 = vmax.f32 %v1512_v60, 0.0 }
 0x229   : > { %v1403_v2 = vadd.f32 %v1402_v63, %v1244_v44  ;;  %v1404_v4 = vpop.f32.mrb[79].mxu0  ;;  %1726 = vmatpush1.bf16.msra.mxu0 %v3839_v46  ;;  %v1584_v8 = vmax.f32 %v1399_v57, 0.0  ;;  %v1518_v10 = vadd.f32 %v1517_v7, %v1244_v44  ;;  %v1587_v17 = vmax.f32 %v1514_v1, 0.0  ;;  %v1264_v57 = vpop.permute.xlu1 %1263 }
 0x22a   : > { %v1405_v6 = vadd.f32 %v1404_v4, %v1244_v44  ;;  %v1585_v12 = vmax.f32 %v1401_v61, 0.0  ;;  %v1590_v13 = vmax.f32 %v1516_v5, 0.0  ;;  %v1259_v61 = vpop.permute.xlu0 %1258 }
 0x22b   : > { %v1588_v9 = vmax.f32 %v1403_v2, 0.0  ;;  %v1591_v21 = vmax.f32 %v1518_v10, 0.0 }
 0x22c   : > { %v1589_v14 = vmax.f32 %v1405_v6, 0.0  ;;  %v3853_v24 = vpack.c.bf16 %v1590_v13, %v1586_v11 }
 0x22d   : > { %v3851_v18 = vpack.c.bf16 %v1588_v9, %v1584_v8  ;;  %v3857_v27 = vpack.c.bf16 %v1591_v21, %v1587_v17  ;;  %v1521_v29 = vpop.f32.mrb[80].mxu1 }
 0x22e   : > { %v3855_v25 = vpack.c.bf16 %v1589_v14, %v1585_v12  ;;  %v1408_v26 = vpop.f32.mrb[80].mxu0  ;;  %v1522_v31 = vadd.f32 %v1521_v29, %v1249_v23  ;;  %v1523_v33 = vpop.f32.mrb[81].mxu1 }
 0x22f   : > { %v1409_v28 = vadd.f32 %v1408_v26, %v1249_v23  ;;  %v1410_v30 = vpop.f32.mrb[81].mxu0  ;;  %v1524_v35 = vadd.f32 %v1523_v33, %v1249_v23  ;;  %v1525_v37 = vpop.f32.mrb[82].mxu1  ;;  %1840 = vmatprep.subr.bf16.mxu1 %v3857_v27 }
 0x230   : > { %v1411_v32 = vadd.f32 %v1410_v30, %v1249_v23  ;;  %v1412_v34 = vpop.f32.mrb[82].mxu0  ;;  %1727 = vmatprep.subr.bf16.mxu0 %v3855_v25  ;;  %v1526_v39 = vadd.f32 %v1525_v37, %v1254_v15  ;;  %v1527_v41 = vpop.f32.mrb[83].mxu1  ;;  %1841 = vmatpush1.bf16.msra.mxu1 %v3853_v24  ;;  %v1594_v45 = vmax.f32 %v1522_v31, 0.0 }
 0x231   : > { %v1413_v36 = vadd.f32 %v1412_v34, %v1254_v15  ;;  %v1414_v38 = vpop.f32.mrb[83].mxu0  ;;  %1728 = vmatpush1.bf16.msra.mxu0 %v3851_v18  ;;  %v1592_v42 = vmax.f32 %v1409_v28, 0.0  ;;  %v1528_v44 = vadd.f32 %v1527_v41, %v1254_v15  ;;  %v1595_v58 = vmax.f32 %v1524_v35, 0.0 }
 0x232   : > { %v1415_v40 = vadd.f32 %v1414_v38, %v1254_v15  ;;  %v1593_v47 = vmax.f32 %v1411_v32, 0.0  ;;  %v1598_v48 = vmax.f32 %v1526_v39, 0.0  ;;  %v1274_v32 = vpop.permute.xlu1 %1273 }
 0x233   : > { %v1596_v43 = vmax.f32 %v1413_v36, 0.0  ;;  %v1599_v60 = vmax.f32 %v1528_v44, 0.0  ;;  %v1269_v36 = vpop.permute.xlu0 %1268 }
 0x234   : > { %v1597_v54 = vmax.f32 %v1415_v40, 0.0  ;;  %v3865_v62 = vpack.c.bf16 %v1598_v48, %v1594_v45 }
 0x235   : > { %v3863_v59 = vpack.c.bf16 %v1596_v43, %v1592_v42  ;;  %v3869_v2 = vpack.c.bf16 %v1599_v60, %v1595_v58  ;;  %v1531_v4 = vpop.f32.mrb[84].mxu1 }
 0x236   : > { %v3867_v63 = vpack.c.bf16 %v1597_v54, %v1593_v47  ;;  %v1418_v1 = vpop.f32.mrb[84].mxu0  ;;  %v1532_v6 = vadd.f32 %v1531_v4, %v1259_v61  ;;  %v1533_v8 = vpop.f32.mrb[85].mxu1 }
 0x237   : > { %v1419_v3 = vadd.f32 %v1418_v1, %v1259_v61  ;;  %v1420_v5 = vpop.f32.mrb[85].mxu0  ;;  %v1534_v10 = vadd.f32 %v1533_v8, %v1259_v61  ;;  %v1535_v12 = vpop.f32.mrb[86].mxu1  ;;  %1842 = vmatprep.subr.bf16.mxu1 %v3869_v2 }
 0x238   : > { %v1421_v7 = vadd.f32 %v1420_v5, %v1259_v61  ;;  %v1422_v9 = vpop.f32.mrb[86].mxu0  ;;  %1729 = vmatprep.subr.bf16.mxu0 %v3867_v63  ;;  %v1536_v14 = vadd.f32 %v1535_v12, %v1264_v57  ;;  %v1537_v17 = vpop.f32.mrb[87].mxu1  ;;  %1843 = vmatpush1.bf16.msra.mxu1 %v3865_v62  ;;  %v1602_v28 = vmax.f32 %v1532_v6, 0.0 }
 0x239   : > { %v1423_v11 = vadd.f32 %v1422_v9, %v1264_v57  ;;  %v1424_v13 = vpop.f32.mrb[87].mxu0  ;;  %1730 = vmatpush1.bf16.msra.mxu0 %v3863_v59  ;;  %v1600_v21 = vmax.f32 %v1419_v3, 0.0  ;;  %v1538_v26 = vadd.f32 %v1537_v17, %v1264_v57  ;;  %v1603_v33 = vmax.f32 %v1534_v10, 0.0 }
 0x23a   : > { %v1425_v15 = vadd.f32 %v1424_v13, %v1264_v57  ;;  %v1601_v29 = vmax.f32 %v1421_v7, 0.0  ;;  %v1606_v30 = vmax.f32 %v1536_v14, 0.0 }
 0x23b   : > { %v1604_v23 = vmax.f32 %v1423_v11, 0.0  ;;  %v1607_v35 = vmax.f32 %v1538_v26, 0.0  ;;  %v1284_v11 = vpop.permute.xlu1 %1283 }
 0x23c   : > { %v1605_v31 = vmax.f32 %v1425_v15, 0.0  ;;  %v3877_v37 = vpack.c.bf16 %v1606_v30, %v1602_v28  ;;  %v1279_v15 = vpop.permute.xlu0 %1278 }
 0x23d   : > { %v3875_v34 = vpack.c.bf16 %v1604_v23, %v1600_v21  ;;  %v3881_v40 = vpack.c.bf16 %v1607_v35, %v1603_v33  ;;  %v1541_v42 = vpop.f32.mrb[88].mxu1 }
 0x23e   : > { %v3879_v38 = vpack.c.bf16 %v1605_v31, %v1601_v29  ;;  %v1428_v39 = vpop.f32.mrb[88].mxu0  ;;  %v1542_v44 = vadd.f32 %v1541_v42, %v1269_v36  ;;  %v1543_v47 = vpop.f32.mrb[89].mxu1 }
 0x23f   : > { %v1429_v41 = vadd.f32 %v1428_v39, %v1269_v36  ;;  %v1430_v43 = vpop.f32.mrb[89].mxu0  ;;  %v1544_v54 = vadd.f32 %v1543_v47, %v1269_v36  ;;  %v1545_v58 = vpop.f32.mrb[90].mxu1  ;;  %1844 = vmatprep.subr.bf16.mxu1 %v3881_v40 }
 0x240   : > { %v1431_v45 = vadd.f32 %v1430_v43, %v1269_v36  ;;  %v1432_v48 = vpop.f32.mrb[90].mxu0  ;;  %1731 = vmatprep.subr.bf16.mxu0 %v3879_v38  ;;  %v1546_v61 = vadd.f32 %v1545_v58, %v1274_v32  ;;  %v1547_v3 = vpop.f32.mrb[91].mxu1  ;;  %1845 = vmatpush1.bf16.msra.mxu1 %v3877_v37  ;;  %v1610_v7 = vmax.f32 %v1542_v44, 0.0 }
 0x241   : > { %v1433_v57 = vadd.f32 %v1432_v48, %v1274_v32  ;;  %v1434_v60 = vpop.f32.mrb[91].mxu0  ;;  %1732 = vmatpush1.bf16.msra.mxu0 %v3875_v34  ;;  %v1608_v4 = vmax.f32 %v1429_v41, 0.0  ;;  %v1548_v6 = vadd.f32 %v1547_v3, %v1274_v32  ;;  %v1611_v12 = vmax.f32 %v1544_v54, 0.0 }
 0x242   : > { %v1435_v1 = vadd.f32 %v1434_v60, %v1274_v32  ;;  %v1609_v8 = vmax.f32 %v1431_v45, 0.0  ;;  %v1614_v9 = vmax.f32 %v1546_v61, 0.0 }
 0x243   : > { %v1612_v5 = vmax.f32 %v1433_v57, 0.0  ;;  %v1615_v14 = vmax.f32 %v1548_v6, 0.0 }
 0x244   : > { %v1613_v10 = vmax.f32 %v1435_v1, 0.0  ;;  %v3889_v17 = vpack.c.bf16 %v1614_v9, %v1610_v7  ;;  %v3310_v9 = vld [vmem:[%s4086_s3 + $0x48] sm:$0xff]  }
 0x245   : > { %v3887_v13 = vpack.c.bf16 %v1612_v5, %v1608_v4  ;;  %v3893_v26 = vpack.c.bf16 %v1615_v14, %v1611_v12  ;;  %v1551_v29 = vpop.f32.mrb[92].mxu1  ;;  %v3313_v12 = vld [vmem:[%s4086_s3 + $0x60] sm:$0xff]   ;;  %v3314_v14 = vld [vmem:[%s4086_s3 + $0x68] sm:$0xff]  }
 0x246   : > { %v3891_v21 = vpack.c.bf16 %v1613_v10, %v1609_v8  ;;  %v1438_v23 = vpop.f32.mrb[92].mxu0  ;;  %v1552_v31 = vadd.f32 %v1551_v29, %v1279_v15  ;;  %v1553_v33 = vpop.f32.mrb[93].mxu1  ;;  %v3309_v8 = vld [vmem:[%s4086_s3 + $0x40] sm:$0xff]   ;;  %v3311_v10 = vld [vmem:[%s4086_s3 + $0x50] sm:$0xff]  }
 0x247   : > { %v1439_v28 = vadd.f32 %v1438_v23, %v1279_v15  ;;  %v1440_v30 = vpop.f32.mrb[93].mxu0  ;;  %v1554_v36 = vadd.f32 %v1553_v33, %v1279_v15  ;;  %v1555_v41 = vpop.f32.mrb[94].mxu1  ;;  %1846 = vmatprep.subr.bf16.mxu1 %v3893_v26  ;;  %v3316_v23 = vld [vmem:[%s4086_s3 + $0x78] sm:$0xff]  }
 0x248   : > { %v1441_v32 = vadd.f32 %v1440_v30, %v1279_v15  ;;  %v1442_v35 = vpop.f32.mrb[94].mxu0  ;;  %1733 = vmatprep.subr.bf16.mxu0 %v3891_v21  ;;  %v1556_v43 = vadd.f32 %v1555_v41, %v1284_v11  ;;  %v1557_v45 = vpop.f32.mrb[95].mxu1  ;;  %1847 = vmatpush1.bf16.msra.mxu1 %v3889_v17  ;;  %v1618_v57 = vmax.f32 %v1552_v31, 0.0  ;;  %v3315_v15 = vld [vmem:[%s4086_s3 + $0x70] sm:$0xff]  }
 0x249   : > { %v1443_v39 = vadd.f32 %v1442_v35, %v1284_v11  ;;  %v1444_v42 = vpop.f32.mrb[95].mxu0  ;;  %1734 = vmatpush1.bf16.msra.mxu0 %v3887_v13  ;;  %v1616_v47 = vmax.f32 %v1439_v28, 0.0  ;;  %v1558_v54 = vadd.f32 %v1557_v45, %v1284_v11  ;;  %v1619_v1 = vmax.f32 %v1554_v36, 0.0  ;;  %v1955_v28 = vpop.permute.xlu1 %1954 }
 0x24a   : > { %v1445_v44 = vadd.f32 %v1444_v42, %v1284_v11  ;;  %v1617_v58 = vmax.f32 %v1441_v32, 0.0  ;;  %v1622_v60 = vmax.f32 %v1556_v43, 0.0  ;;  %v3312_v11 = vld [vmem:[%s4086_s3 + $0x58] sm:$0xff]   ;;  %v1950_v29 = vpop.permute.xlu0 %1949 }
 0x24b   : > { %v1620_v48 = vmax.f32 %v1443_v39, 0.0  ;;  %v1623_v4 = vmax.f32 %v1558_v54, 0.0 }
 0x24c   : > { %v1621_v61 = vmax.f32 %v1445_v44, 0.0  ;;  %v3901_v5 = vpack.c.bf16 %v1622_v60, %v1618_v57 }
 0x24d   : > { %v3899_v3 = vpack.c.bf16 %v1620_v48, %v1616_v47  ;;  %v3905_v7 = vpack.c.bf16 %v1623_v4, %v1619_v1 }
 0x24e   : > { %v3903_v6 = vpack.c.bf16 %v1621_v61, %v1617_v58 }
 0x24f   : > { %1848 = vmatprep.subr.bf16.mxu1 %v3905_v7 }
 0x250   : > { %1735 = vmatprep.subr.bf16.mxu0 %v3903_v6  ;;  %1849 = vmatpush1.bf16.msra.mxu1 %v3901_v5 }
 0x251   : > { %1736 = vmatpush1.bf16.msra.mxu0 %v3899_v3 }
 0x253   : > { %1867 = vmatmul.mubr.bf16.vlgmr.msra.gmra.mrb[32].mxu1 %v3309_v8 }
 0x254   : > { %1754 = vmatmul.mubr.bf16.vlgmr.msra.gmra.mrb[32].mxu0 %v3309_v8  ;;  %1876 = vmatprep.mubr.bf16.mxu1 %v3421_v0 }
 0x255   : > { %1763 = vmatprep.mubr.bf16.mxu0 %v3421_v0 }
 0x25b   : > { %1877 = vmatmul.mubr.bf16.gmra.mrb[36].mxu1 %v3310_v9 }
 0x25c   : > { %1764 = vmatmul.mubr.bf16.gmra.mrb[36].mxu0 %v3310_v9  ;;  %1886 = vmatprep.mubr.bf16.mxu1 %v3421_v0  ;;  %v1965_v9 = vpop.permute.xlu1 %1964 }
 0x25d   : > { %1773 = vmatprep.mubr.bf16.mxu0 %v3421_v0 }
 0x263   : > { %1887 = vmatmul.mubr.bf16.gmra.mrb[40].mxu1 %v3311_v10 }
 0x264   : > { %1774 = vmatmul.mubr.bf16.gmra.mrb[40].mxu0 %v3311_v10  ;;  %1896 = vmatprep.mubr.bf16.mxu1 %v3421_v0 }
 0x265   : > { %1783 = vmatprep.mubr.bf16.mxu0 %v3421_v0 }
 0x26b   : > { %1897 = vmatmul.mubr.bf16.gmra.mrb[44].mxu1 %v3312_v11 }
 0x26c   : > { %1784 = vmatmul.mubr.bf16.gmra.mrb[44].mxu0 %v3312_v11  ;;  %1906 = vmatprep.mubr.bf16.mxu1 %v3421_v0 }
 0x26d   : > { %1793 = vmatprep.mubr.bf16.mxu0 %v3421_v0 }
 0x273   : > { %1907 = vmatmul.mubr.bf16.gmra.mrb[48].mxu1 %v3313_v12 }
 0x274   : > { %1794 = vmatmul.mubr.bf16.gmra.mrb[48].mxu0 %v3313_v12  ;;  %1916 = vmatprep.mubr.bf16.mxu1 %v3421_v0 }
 0x275   : > { %1803 = vmatprep.mubr.bf16.mxu0 %v3421_v0 }
 0x27b   : > { %1917 = vmatmul.mubr.bf16.gmra.mrb[52].mxu1 %v3314_v14 }
 0x27c   : > { %1804 = vmatmul.mubr.bf16.gmra.mrb[52].mxu0 %v3314_v14  ;;  %1926 = vmatprep.mubr.bf16.mxu1 %v3421_v0  ;;  %v1960_v14 = vpop.permute.xlu0 %1959 }
 0x27d   : > { %1813 = vmatprep.mubr.bf16.mxu0 %v3421_v0 }
 0x283   : > { %1927 = vmatmul.mubr.bf16.gmra.mrb[56].mxu1 %v3315_v15 }
 0x284   : > { %1814 = vmatmul.mubr.bf16.gmra.mrb[56].mxu0 %v3315_v15  ;;  %1936 = vmatprep.mubr.bf16.mxu1 %v3421_v0 }
 0x285   : > { %1823 = vmatprep.mubr.bf16.mxu0 %v3421_v0 }
 0x28b   : > { %1937 = vmatmul.mubr.bf16.gmra.mrb[60].mxu1 %v3316_v23 }
 0x28c   : > { %1824 = vmatmul.mubr.bf16.gmra.mrb[60].mxu0 %v3316_v23  ;;  %2494 = vmatprep.mubr.bf16.mxu1 %v3421_v0 }
 0x28d   : > { %2381 = vmatprep.mubr.bf16.mxu0 %v3421_v0 }
 0x326   : > { %v1868_v32 = vpop.f32.mrb[32].mxu1 }
 0x327   : > { %v1755_v30 = vpop.f32.mrb[32].mxu0  ;;  %v2029_v35 = vadd.f32 %v1950_v29, %v1868_v32  ;;  %v1870_v39 = vpop.f32.mrb[33].mxu1 }
 0x328   : > { %v2027_v31 = vadd.f32 %v1950_v29, %v1755_v30  ;;  %v1757_v33 = vpop.f32.mrb[33].mxu0  ;;  %v2030_v42 = vadd.f32 %v1950_v29, %v1870_v39  ;;  %v1872_v44 = vpop.f32.mrb[34].mxu1 }
 0x329   : > { %v2028_v36 = vadd.f32 %v1950_v29, %v1757_v33  ;;  %v1759_v41 = vpop.f32.mrb[34].mxu0  ;;  %v2033_v47 = vadd.f32 %v1955_v28, %v1872_v44  ;;  %v1874_v54 = vpop.f32.mrb[35].mxu1  ;;  %v2093_v61 = vmax.f32 %v2029_v35, 0.0 }
 0x32a   : > { %v2031_v43 = vadd.f32 %v1955_v28, %v1759_v41  ;;  %v1761_v45 = vpop.f32.mrb[35].mxu0  ;;  %v2091_v57 = vmax.f32 %v2027_v31, 0.0  ;;  %v2034_v60 = vadd.f32 %v1955_v28, %v1874_v54  ;;  %v2094_v10 = vmax.f32 %v2030_v42, 0.0 }
 0x32b   : > { %v2032_v48 = vadd.f32 %v1955_v28, %v1761_v45  ;;  %v2092_v1 = vmax.f32 %v2028_v36, 0.0  ;;  %v2097_v4 = vmax.f32 %v2033_v47, 0.0 }
 0x32c   : > { %v2095_v58 = vmax.f32 %v2031_v43, 0.0  ;;  %v2098_v12 = vmax.f32 %v2034_v60, 0.0 }
 0x32d   : > { %v2096_v8 = vmax.f32 %v2032_v48, 0.0  ;;  %v2174_v15 = vpack.c.bf16 %v2097_v4, %v2093_v61 }
 0x32e   : > { %v2172_v11 = vpack.c.bf16 %v2095_v58, %v2091_v57  ;;  %v2175_v30 = vpack.c.bf16 %v2098_v12, %v2094_v10  ;;  %v1878_v33 = vpop.f32.mrb[36].mxu1 }
 0x32f   : > { %v2173_v23 = vpack.c.bf16 %v2096_v8, %v2092_v1  ;;  %v1765_v29 = vpop.f32.mrb[36].mxu0  ;;  %v2037_v41 = vadd.f32 %v1960_v14, %v1878_v33  ;;  %v1880_v43 = vpop.f32.mrb[37].mxu1 }
 0x330   : > { %v2035_v32 = vadd.f32 %v1960_v14, %v1765_v29  ;;  %v1767_v39 = vpop.f32.mrb[37].mxu0  ;;  %v2038_v35 = vadd.f32 %v1960_v14, %v1880_v43  ;;  %v1882_v44 = vpop.f32.mrb[38].mxu1  ;;  %2462 = vmatprep.subr.bf16.mxu1 %v2175_v30 }
 0x331   : > { %v2036_v31 = vadd.f32 %v1960_v14, %v1767_v39  ;;  %v1769_v28 = vpop.f32.mrb[38].mxu0  ;;  %2349 = vmatprep.subr.bf16.mxu0 %v2173_v23  ;;  %v2041_v45 = vadd.f32 %v1965_v9, %v1882_v44  ;;  %v1884_v48 = vpop.f32.mrb[39].mxu1  ;;  %2463 = vmatpush1.bf16.msra.mxu1 %v2174_v15  ;;  %v2101_v60 = vmax.f32 %v2037_v41, 0.0 }
 0x332   : > { %v2039_v36 = vadd.f32 %v1965_v9, %v1769_v28  ;;  %v1771_v42 = vpop.f32.mrb[39].mxu0  ;;  %2350 = vmatpush1.bf16.msra.mxu0 %v2172_v11  ;;  %v2099_v54 = vmax.f32 %v2035_v32, 0.0  ;;  %v2042_v58 = vadd.f32 %v1965_v9, %v1884_v48  ;;  %v1975_v8 = vpop.permute.xlu1 %1974  ;;  %v2102_v10 = vmax.f32 %v2038_v35, 0.0 }
 0x333   : > { %v2040_v47 = vadd.f32 %v1965_v9, %v1771_v42  ;;  %v2100_v61 = vmax.f32 %v2036_v31, 0.0  ;;  %v2105_v1 = vmax.f32 %v2041_v45, 0.0  ;;  %v1970_v23 = vpop.permute.xlu0 %1969 }
 0x334   : > { %v2103_v57 = vmax.f32 %v2039_v36, 0.0  ;;  %v2106_v14 = vmax.f32 %v2042_v58, 0.0 }
 0x335   : > { %v2104_v4 = vmax.f32 %v2040_v47, 0.0  ;;  %v2178_v29 = vpack.c.bf16 %v2105_v1, %v2101_v60 }
 0x336   : > { %v2176_v12 = vpack.c.bf16 %v2103_v57, %v2099_v54  ;;  %v2179_v11 = vpack.c.bf16 %v2106_v14, %v2102_v10  ;;  %v1888_v43 = vpop.f32.mrb[40].mxu1 }
 0x337   : > { %v2177_v30 = vpack.c.bf16 %v2104_v4, %v2100_v61  ;;  %v1775_v33 = vpop.f32.mrb[40].mxu0  ;;  %v2045_v15 = vadd.f32 %v1970_v23, %v1888_v43  ;;  %v1890_v36 = vpop.f32.mrb[41].mxu1 }
 0x338   : > { %v2043_v39 = vadd.f32 %v1970_v23, %v1775_v33  ;;  %v1777_v28 = vpop.f32.mrb[41].mxu0  ;;  %v2046_v41 = vadd.f32 %v1970_v23, %v1890_v36  ;;  %v1892_v44 = vpop.f32.mrb[42].mxu1  ;;  %2464 = vmatprep.subr.bf16.mxu1 %v2179_v11 }
 0x339   : > { %v2044_v32 = vadd.f32 %v1970_v23, %v1777_v28  ;;  %v1779_v9 = vpop.f32.mrb[42].mxu0  ;;  %2351 = vmatprep.subr.bf16.mxu0 %v2177_v30  ;;  %v2049_v42 = vadd.f32 %v1975_v8, %v1892_v44  ;;  %v1894_v47 = vpop.f32.mrb[43].mxu1  ;;  %2465 = vmatpush1.bf16.msra.mxu1 %v2178_v29  ;;  %v2109_v58 = vmax.f32 %v2045_v15, 0.0 }
 0x33a   : > { %v2047_v31 = vadd.f32 %v1975_v8, %v1779_v9  ;;  %v1781_v35 = vpop.f32.mrb[43].mxu0  ;;  %2352 = vmatpush1.bf16.msra.mxu0 %v2176_v12  ;;  %v2107_v48 = vmax.f32 %v2043_v39, 0.0  ;;  %v2050_v57 = vadd.f32 %v1975_v8, %v1894_v47  ;;  %v1985_v4 = vpop.permute.xlu1 %1984  ;;  %v2110_v10 = vmax.f32 %v2046_v41, 0.0 }
 0x33b   : > { %v2048_v45 = vadd.f32 %v1975_v8, %v1781_v35  ;;  %v2108_v60 = vmax.f32 %v2044_v32, 0.0  ;;  %v2113_v61 = vmax.f32 %v2049_v42, 0.0  ;;  %v1980_v30 = vpop.permute.xlu0 %1979 }
 0x33c   : > { %v2111_v54 = vmax.f32 %v2047_v31, 0.0  ;;  %v2114_v23 = vmax.f32 %v2050_v57, 0.0 }
 0x33d   : > { %v2112_v1 = vmax.f32 %v2048_v45, 0.0  ;;  %v2182_v33 = vpack.c.bf16 %v2113_v61, %v2109_v58 }
 0x33e   : > { %v2180_v14 = vpack.c.bf16 %v2111_v54, %v2107_v48  ;;  %v2183_v12 = vpack.c.bf16 %v2114_v23, %v2110_v10  ;;  %v1898_v36 = vpop.f32.mrb[44].mxu1 }
 0x33f   : > { %v2181_v11 = vpack.c.bf16 %v2112_v1, %v2108_v60  ;;  %v1785_v43 = vpop.f32.mrb[44].mxu0  ;;  %v2053_v29 = vadd.f32 %v1980_v30, %v1898_v36  ;;  %v1900_v31 = vpop.f32.mrb[45].mxu1 }
 0x340   : > { %v2051_v28 = vadd.f32 %v1980_v30, %v1785_v43  ;;  %v1787_v9 = vpop.f32.mrb[45].mxu0  ;;  %v2054_v15 = vadd.f32 %v1980_v30, %v1900_v31  ;;  %v1902_v44 = vpop.f32.mrb[46].mxu1  ;;  %2466 = vmatprep.subr.bf16.mxu1 %v2183_v12 }
 0x341   : > { %v2052_v39 = vadd.f32 %v1980_v30, %v1787_v9  ;;  %v1789_v8 = vpop.f32.mrb[46].mxu0  ;;  %2353 = vmatprep.subr.bf16.mxu0 %v2181_v11  ;;  %v2057_v35 = vadd.f32 %v1985_v4, %v1902_v44  ;;  %v1904_v45 = vpop.f32.mrb[47].mxu1  ;;  %2467 = vmatpush1.bf16.msra.mxu1 %v2182_v33  ;;  %v2117_v57 = vmax.f32 %v2053_v29, 0.0 }
 0x342   : > { %v2055_v32 = vadd.f32 %v1985_v4, %v1789_v8  ;;  %v1791_v41 = vpop.f32.mrb[47].mxu0  ;;  %2354 = vmatpush1.bf16.msra.mxu0 %v2180_v14  ;;  %v2115_v47 = vmax.f32 %v2051_v28, 0.0  ;;  %v2058_v54 = vadd.f32 %v1985_v4, %v1904_v45  ;;  %v1995_v1 = vpop.permute.xlu1 %1994  ;;  %v2118_v10 = vmax.f32 %v2054_v15, 0.0 }
 0x343   : > { %v2056_v42 = vadd.f32 %v1985_v4, %v1791_v41  ;;  %v2116_v58 = vmax.f32 %v2052_v39, 0.0  ;;  %v2121_v60 = vmax.f32 %v2057_v35, 0.0  ;;  %v1990_v11 = vpop.permute.xlu0 %1989 }
 0x344   : > { %v2119_v48 = vmax.f32 %v2055_v32, 0.0  ;;  %v2122_v30 = vmax.f32 %v2058_v54, 0.0 }
 0x345   : > { %v2120_v61 = vmax.f32 %v2056_v42, 0.0  ;;  %v2186_v43 = vpack.c.bf16 %v2121_v60, %v2117_v57 }
 0x346   : > { %v2184_v23 = vpack.c.bf16 %v2119_v48, %v2115_v47  ;;  %v2187_v14 = vpack.c.bf16 %v2122_v30, %v2118_v10  ;;  %v1908_v31 = vpop.f32.mrb[48].mxu1 }
 0x347   : > { %v2185_v12 = vpack.c.bf16 %v2120_v61, %v2116_v58  ;;  %v1795_v36 = vpop.f32.mrb[48].mxu0  ;;  %v2061_v33 = vadd.f32 %v1990_v11, %v1908_v31  ;;  %v1910_v32 = vpop.f32.mrb[49].mxu1 }
 0x348   : > { %v2059_v9 = vadd.f32 %v1990_v11, %v1795_v36  ;;  %v1797_v8 = vpop.f32.mrb[49].mxu0  ;;  %v2062_v29 = vadd.f32 %v1990_v11, %v1910_v32  ;;  %v1912_v44 = vpop.f32.mrb[50].mxu1  ;;  %2468 = vmatprep.subr.bf16.mxu1 %v2187_v14 }
 0x349   : > { %v2060_v28 = vadd.f32 %v1990_v11, %v1797_v8  ;;  %v1799_v4 = vpop.f32.mrb[50].mxu0  ;;  %2355 = vmatprep.subr.bf16.mxu0 %v2185_v12  ;;  %v2065_v41 = vadd.f32 %v1995_v1, %v1912_v44  ;;  %v1914_v42 = vpop.f32.mrb[51].mxu1  ;;  %2469 = vmatpush1.bf16.msra.mxu1 %v2186_v43  ;;  %v2125_v54 = vmax.f32 %v2061_v33, 0.0 }
 0x34a   : > { %v2063_v39 = vadd.f32 %v1995_v1, %v1799_v4  ;;  %v1801_v15 = vpop.f32.mrb[51].mxu0  ;;  %2356 = vmatpush1.bf16.msra.mxu0 %v2184_v23  ;;  %v2123_v45 = vmax.f32 %v2059_v9, 0.0  ;;  %v2066_v48 = vadd.f32 %v1995_v1, %v1914_v42  ;;  %v2005_v61 = vpop.permute.xlu1 %2004  ;;  %v2126_v10 = vmax.f32 %v2062_v29, 0.0 }
 0x34b   : > { %v2064_v35 = vadd.f32 %v1995_v1, %v1801_v15  ;;  %v2124_v57 = vmax.f32 %v2060_v28, 0.0  ;;  %v2129_v58 = vmax.f32 %v2065_v41, 0.0  ;;  %v2000_v12 = vpop.permute.xlu0 %1999 }
 0x34c   : > { %v2127_v47 = vmax.f32 %v2063_v39, 0.0  ;;  %v2130_v11 = vmax.f32 %v2066_v48, 0.0 }
 0x34d   : > { %v2128_v60 = vmax.f32 %v2064_v35, 0.0  ;;  %v2190_v36 = vpack.c.bf16 %v2129_v58, %v2125_v54 }
 0x34e   : > { %v2188_v30 = vpack.c.bf16 %v2127_v47, %v2123_v45  ;;  %v2191_v23 = vpack.c.bf16 %v2130_v11, %v2126_v10  ;;  %v1918_v32 = vpop.f32.mrb[52].mxu1 }
 0x34f   : > { %v2189_v14 = vpack.c.bf16 %v2128_v60, %v2124_v57  ;;  %v1805_v31 = vpop.f32.mrb[52].mxu0  ;;  %v2069_v43 = vadd.f32 %v2000_v12, %v1918_v32  ;;  %v1920_v39 = vpop.f32.mrb[53].mxu1 }
 0x350   : > { %v2067_v8 = vadd.f32 %v2000_v12, %v1805_v31  ;;  %v1807_v4 = vpop.f32.mrb[53].mxu0  ;;  %v2070_v33 = vadd.f32 %v2000_v12, %v1920_v39  ;;  %v1922_v44 = vpop.f32.mrb[54].mxu1  ;;  %2470 = vmatprep.subr.bf16.mxu1 %v2191_v23 }
 0x351   : > { %v2068_v9 = vadd.f32 %v2000_v12, %v1807_v4  ;;  %v1809_v1 = vpop.f32.mrb[54].mxu0  ;;  %2357 = vmatprep.subr.bf16.mxu0 %v2189_v14  ;;  %v2073_v15 = vadd.f32 %v2005_v61, %v1922_v44  ;;  %v1924_v35 = vpop.f32.mrb[55].mxu1  ;;  %2471 = vmatpush1.bf16.msra.mxu1 %v2190_v36  ;;  %v2133_v48 = vmax.f32 %v2069_v43, 0.0 }
 0x352   : > { %v2071_v28 = vadd.f32 %v2005_v61, %v1809_v1  ;;  %v1811_v29 = vpop.f32.mrb[55].mxu0  ;;  %2358 = vmatpush1.bf16.msra.mxu0 %v2188_v30  ;;  %v2131_v42 = vmax.f32 %v2067_v8, 0.0  ;;  %v2074_v47 = vadd.f32 %v2005_v61, %v1924_v35  ;;  %v2015_v60 = vpop.permute.xlu1 %2014  ;;  %v2134_v10 = vmax.f32 %v2070_v33, 0.0 }
 0x353   : > { %v2072_v41 = vadd.f32 %v2005_v61, %v1811_v29  ;;  %v2132_v54 = vmax.f32 %v2068_v9, 0.0  ;;  %v2137_v57 = vmax.f32 %v2073_v15, 0.0  ;;  %v2010_v14 = vpop.permute.xlu0 %2009 }
 0x354   : > { %v2135_v45 = vmax.f32 %v2071_v28, 0.0  ;;  %v2138_v12 = vmax.f32 %v2074_v47, 0.0 }
 0x355   : > { %v2136_v58 = vmax.f32 %v2072_v41, 0.0  ;;  %v2194_v31 = vpack.c.bf16 %v2137_v57, %v2133_v48 }
 0x356   : > { %v2192_v11 = vpack.c.bf16 %v2135_v45, %v2131_v42  ;;  %v2195_v30 = vpack.c.bf16 %v2138_v12, %v2134_v10  ;;  %v1928_v39 = vpop.f32.mrb[56].mxu1 }
 0x357   : > { %v2193_v23 = vpack.c.bf16 %v2136_v58, %v2132_v54  ;;  %v1815_v32 = vpop.f32.mrb[56].mxu0  ;;  %v2077_v36 = vadd.f32 %v2010_v14, %v1928_v39  ;;  %v1930_v28 = vpop.f32.mrb[57].mxu1 }
 0x358   : > { %v2075_v4 = vadd.f32 %v2010_v14, %v1815_v32  ;;  %v1817_v1 = vpop.f32.mrb[57].mxu0  ;;  %v2078_v43 = vadd.f32 %v2010_v14, %v1930_v28  ;;  %v1932_v44 = vpop.f32.mrb[58].mxu1  ;;  %2472 = vmatprep.subr.bf16.mxu1 %v2195_v30 }
 0x359   : > { %v2076_v8 = vadd.f32 %v2010_v14, %v1817_v1  ;;  %v1819_v61 = vpop.f32.mrb[58].mxu0  ;;  %2359 = vmatprep.subr.bf16.mxu0 %v2193_v23  ;;  %v2081_v29 = vadd.f32 %v2015_v60, %v1932_v44  ;;  %v1934_v41 = vpop.f32.mrb[59].mxu1  ;;  %2473 = vmatpush1.bf16.msra.mxu1 %v2194_v31  ;;  %v2141_v47 = vmax.f32 %v2077_v36, 0.0 }
 0x35a   : > { %v2079_v9 = vadd.f32 %v2015_v60, %v1819_v61  ;;  %v1821_v33 = vpop.f32.mrb[59].mxu0  ;;  %2360 = vmatpush1.bf16.msra.mxu0 %v2192_v11  ;;  %v2139_v35 = vmax.f32 %v2075_v4, 0.0  ;;  %v2082_v45 = vadd.f32 %v2015_v60, %v1934_v41  ;;  %v2025_v58 = vpop.permute.xlu1 %2024  ;;  %v2142_v10 = vmax.f32 %v2078_v43, 0.0 }
 0x35b   : > { %v2080_v15 = vadd.f32 %v2015_v60, %v1821_v33  ;;  %v2140_v48 = vmax.f32 %v2076_v8, 0.0  ;;  %v2145_v54 = vmax.f32 %v2081_v29, 0.0  ;;  %v2020_v23 = vpop.permute.xlu0 %2019 }
 0x35c   : > { %v2143_v42 = vmax.f32 %v2079_v9, 0.0  ;;  %v2146_v14 = vmax.f32 %v2082_v45, 0.0 }
 0x35d   : > { %v2144_v57 = vmax.f32 %v2080_v15, 0.0  ;;  %v2198_v32 = vpack.c.bf16 %v2145_v54, %v2141_v47 }
 0x35e   : > { %v2196_v12 = vpack.c.bf16 %v2143_v42, %v2139_v35  ;;  %v2199_v11 = vpack.c.bf16 %v2146_v14, %v2142_v10  ;;  %v1938_v28 = vpop.f32.mrb[60].mxu1 }
 0x35f   : > { %v2197_v30 = vpack.c.bf16 %v2144_v57, %v2140_v48  ;;  %v1825_v39 = vpop.f32.mrb[60].mxu0  ;;  %v2085_v31 = vadd.f32 %v2020_v23, %v1938_v28  ;;  %v1940_v9 = vpop.f32.mrb[61].mxu1  ;;  %v3322_v28 = vld [vmem:[%s4086_s3 + $0xa8] sm:$0xff]  }
 0x360   : > { %v2083_v1 = vadd.f32 %v2020_v23, %v1825_v39  ;;  %v1827_v61 = vpop.f32.mrb[61].mxu0  ;;  %v2086_v36 = vadd.f32 %v2020_v23, %v1940_v9  ;;  %v1942_v44 = vpop.f32.mrb[62].mxu1  ;;  %2474 = vmatprep.subr.bf16.mxu1 %v2199_v11  ;;  %v3320_v11 = vld [vmem:[%s4086_s3 + $0x98] sm:$0xff]  }
 0x361   : > { %v2084_v4 = vadd.f32 %v2020_v23, %v1827_v61  ;;  %v1829_v60 = vpop.f32.mrb[62].mxu0  ;;  %2361 = vmatprep.subr.bf16.mxu0 %v2197_v30  ;;  %v2089_v33 = vadd.f32 %v2025_v58, %v1942_v44  ;;  %v1944_v15 = vpop.f32.mrb[63].mxu1  ;;  %2475 = vmatpush1.bf16.msra.mxu1 %v2198_v32  ;;  %v2149_v45 = vmax.f32 %v2085_v31, 0.0  ;;  %v3319_v32 = vld [vmem:[%s4086_s3 + $0x90] sm:$0xff]   ;;  %v3324_v31 = vld [vmem:[%s4086_s3 + $0xb8] sm:$0xff]  }
 0x362   : > { %v2087_v8 = vadd.f32 %v2025_v58, %v1829_v60  ;;  %v1831_v43 = vpop.f32.mrb[63].mxu0  ;;  %2362 = vmatpush1.bf16.msra.mxu0 %v2196_v12  ;;  %v2147_v41 = vmax.f32 %v2083_v1, 0.0  ;;  %v2090_v42 = vadd.f32 %v2025_v58, %v1944_v15  ;;  %v2150_v57 = vmax.f32 %v2086_v36, 0.0  ;;  %v3317_v12 = vld [vmem:[%s4086_s3 + $0x80] sm:$0xff]   ;;  %v3323_v61 = vld [vmem:[%s4086_s3 + $0xb0] sm:$0xff]   ;;  %v2224_v9 = vpop.permute.xlu0 %2223 }
 0x363   : > { %v2088_v29 = vadd.f32 %v2025_v58, %v1831_v43  ;;  %v2148_v47 = vmax.f32 %v2084_v4, 0.0  ;;  %v2153_v48 = vmax.f32 %v2089_v33, 0.0  ;;  %v3318_v58 = vld [vmem:[%s4086_s3 + $0x88] sm:$0xff]   ;;  %v3321_v1 = vld [vmem:[%s4086_s3 + $0xa0] sm:$0xff]   ;;  %v2229_v4 = vpop.permute.xlu1 %2228 }
 0x364   : > { %v2151_v35 = vmax.f32 %v2087_v8, 0.0  ;;  %v2154_v14 = vmax.f32 %v2090_v42, 0.0 }
 0x365   : > { %v2152_v54 = vmax.f32 %v2088_v29, 0.0  ;;  %v2202_v23 = vpack.c.bf16 %v2153_v48, %v2149_v45 }
 0x366   : > { %v2200_v10 = vpack.c.bf16 %v2151_v35, %v2147_v41  ;;  %v2203_v39 = vpack.c.bf16 %v2154_v14, %v2150_v57 }
 0x367   : > { %v2201_v30 = vpack.c.bf16 %v2152_v54, %v2148_v47 }
 0x368   : > { %2476 = vmatprep.subr.bf16.mxu1 %v2203_v39 }
 0x369   : > { %2363 = vmatprep.subr.bf16.mxu0 %v2201_v30  ;;  %2477 = vmatpush1.bf16.msra.mxu1 %v2202_v23 }
 0x36a   : > { %2364 = vmatpush1.bf16.msra.mxu0 %v2200_v10 }
 0x36c   : > { %2495 = vmatmul.mubr.bf16.vlgmr.msra.gmra.mrb[96].mxu1 %v3317_v12 }
 0x36d   : > { %2382 = vmatmul.mubr.bf16.vlgmr.msra.gmra.mrb[96].mxu0 %v3317_v12  ;;  %2504 = vmatprep.mubr.bf16.mxu1 %v3421_v0 }
 0x36e   : > { %2391 = vmatprep.mubr.bf16.mxu0 %v3421_v0 }
 0x374   : > { %2505 = vmatmul.mubr.bf16.gmra.mrb[100].mxu1 %v3318_v58 }
 0x375   : > { %2392 = vmatmul.mubr.bf16.gmra.mrb[100].mxu0 %v3318_v58  ;;  %2514 = vmatprep.mubr.bf16.mxu1 %v3421_v0  ;;  %v2239_v58 = vpop.permute.xlu1 %2238 }
 0x376   : > { %2401 = vmatprep.mubr.bf16.mxu0 %v3421_v0 }
 0x37c   : > { %2515 = vmatmul.mubr.bf16.gmra.mrb[104].mxu1 %v3319_v32 }
 0x37d   : > { %2402 = vmatmul.mubr.bf16.gmra.mrb[104].mxu0 %v3319_v32  ;;  %2524 = vmatprep.mubr.bf16.mxu1 %v3421_v0 }
 0x37e   : > { %2411 = vmatprep.mubr.bf16.mxu0 %v3421_v0 }
 0x384   : > { %2525 = vmatmul.mubr.bf16.gmra.mrb[108].mxu1 %v3320_v11 }
 0x385   : > { %2412 = vmatmul.mubr.bf16.gmra.mrb[108].mxu0 %v3320_v11  ;;  %2534 = vmatprep.mubr.bf16.mxu1 %v3421_v0 }
 0x386   : > { %2421 = vmatprep.mubr.bf16.mxu0 %v3421_v0 }
 0x38c   : > { %2535 = vmatmul.mubr.bf16.gmra.mrb[112].mxu1 %v3321_v1 }
 0x38d   : > { %2422 = vmatmul.mubr.bf16.gmra.mrb[112].mxu0 %v3321_v1  ;;  %2544 = vmatprep.mubr.bf16.mxu1 %v3421_v0 }
 0x38e   : > { %2431 = vmatprep.mubr.bf16.mxu0 %v3421_v0 }
 0x394   : > { %2545 = vmatmul.mubr.bf16.gmra.mrb[116].mxu1 %v3322_v28 }
 0x395   : > { %2432 = vmatmul.mubr.bf16.gmra.mrb[116].mxu0 %v3322_v28  ;;  %2554 = vmatprep.mubr.bf16.mxu1 %v3421_v0  ;;  %v2234_v28 = vpop.permute.xlu0 %2233 }
 0x396   : > { %2441 = vmatprep.mubr.bf16.mxu0 %v3421_v0 }
 0x39c   : > { %2555 = vmatmul.mubr.bf16.gmra.mrb[120].mxu1 %v3323_v61 }
 0x39d   : > { %2442 = vmatmul.mubr.bf16.gmra.mrb[120].mxu0 %v3323_v61  ;;  %2564 = vmatprep.mubr.bf16.mxu1 %v3421_v0 }
 0x39e   : > { %2451 = vmatprep.mubr.bf16.mxu0 %v3421_v0 }
 0x3a4   : > { %2565 = vmatmul.mubr.bf16.gmra.mrb[124].mxu1 %v3324_v31 }
 0x3a5   : > { %2452 = vmatmul.mubr.bf16.gmra.mrb[124].mxu0 %v3324_v31  ;;  %2747 = vmatprep.mubr.bf16.mxu1 %v3421_v0 }
 0x3a6   : > { %2706 = vmatprep.mubr.bf16.mxu0 %v3421_v0 }
 0x43f   : > { %v2496_v8 = vpop.f32.mrb[96].mxu1 }
 0x440   : > { %v2383_v60 = vpop.f32.mrb[96].mxu0  ;;  %v2497_v43 = vadd.f32 %v2496_v8, %v2224_v9  ;;  %v2498_v29 = vpop.f32.mrb[97].mxu1 }
 0x441   : > { %v2384_v36 = vadd.f32 %v2383_v60, %v2224_v9  ;;  %v2385_v44 = vpop.f32.mrb[97].mxu0  ;;  %v2499_v41 = vadd.f32 %v2498_v29, %v2224_v9  ;;  %v2500_v42 = vpop.f32.mrb[98].mxu1 }
 0x442   : > { %v2386_v33 = vadd.f32 %v2385_v44, %v2224_v9  ;;  %v2387_v15 = vpop.f32.mrb[98].mxu0  ;;  %v2501_v47 = vadd.f32 %v2500_v42, %v2229_v4  ;;  %v2502_v54 = vpop.f32.mrb[99].mxu1  ;;  %v2577_v23 = vmax.f32 %v2497_v43, 0.0 }
 0x443   : > { %v2388_v35 = vadd.f32 %v2387_v15, %v2229_v4  ;;  %v2389_v45 = vpop.f32.mrb[99].mxu0  ;;  %v2575_v57 = vmax.f32 %v2384_v36, 0.0  ;;  %v2503_v14 = vadd.f32 %v2502_v54, %v2229_v4  ;;  %v2578_v32 = vmax.f32 %v2499_v41, 0.0 }
 0x444   : > { %v2390_v48 = vadd.f32 %v2389_v45, %v2229_v4  ;;  %v2576_v30 = vmax.f32 %v2386_v33, 0.0  ;;  %v2581_v39 = vmax.f32 %v2501_v47, 0.0 }
 0x445   : > { %v2579_v10 = vmax.f32 %v2388_v35, 0.0  ;;  %v2582_v1 = vmax.f32 %v2503_v14, 0.0 }
 0x446   : > { %v2580_v12 = vmax.f32 %v2390_v48, 0.0  ;;  %v2644_v61 = vpack.c.bf16 %v2581_v39, %v2577_v23 }
 0x447   : > { %v2642_v11 = vpack.c.bf16 %v2579_v10, %v2575_v57  ;;  %v2645_v60 = vpack.c.bf16 %v2582_v1, %v2578_v32  ;;  %v2506_v44 = vpop.f32.mrb[100].mxu1 }
 0x448   : > { %v2643_v31 = vpack.c.bf16 %v2580_v12, %v2576_v30  ;;  %v2393_v9 = vpop.f32.mrb[100].mxu0  ;;  %v2507_v15 = vadd.f32 %v2506_v44, %v2234_v28  ;;  %v2508_v35 = vpop.f32.mrb[101].mxu1 }
 0x449   : > { %v2394_v8 = vadd.f32 %v2393_v9, %v2234_v28  ;;  %v2395_v29 = vpop.f32.mrb[101].mxu0  ;;  %v2509_v43 = vadd.f32 %v2508_v35, %v2234_v28  ;;  %v2510_v42 = vpop.f32.mrb[102].mxu1  ;;  %2715 = vmatprep.subr.bf16.mxu1 %v2645_v60 }
 0x44a   : > { %v2396_v36 = vadd.f32 %v2395_v29, %v2234_v28  ;;  %v2397_v4 = vpop.f32.mrb[102].mxu0  ;;  %2674 = vmatprep.subr.bf16.mxu0 %v2643_v31  ;;  %v2511_v45 = vadd.f32 %v2510_v42, %v2239_v58  ;;  %v2512_v48 = vpop.f32.mrb[103].mxu1  ;;  %2716 = vmatpush1.bf16.msra.mxu1 %v2644_v61  ;;  %v2585_v14 = vmax.f32 %v2507_v15, 0.0 }
 0x44b   : > { %v2398_v33 = vadd.f32 %v2397_v4, %v2239_v58  ;;  %v2399_v41 = vpop.f32.mrb[103].mxu0  ;;  %2675 = vmatpush1.bf16.msra.mxu0 %v2642_v11  ;;  %v2583_v54 = vmax.f32 %v2394_v8, 0.0  ;;  %v2513_v10 = vadd.f32 %v2512_v48, %v2239_v58  ;;  %v2249_v12 = vpop.permute.xlu1 %2248  ;;  %v2586_v32 = vmax.f32 %v2509_v43, 0.0 }
 0x44c   : > { %v2400_v47 = vadd.f32 %v2399_v41, %v2239_v58  ;;  %v2584_v23 = vmax.f32 %v2396_v36, 0.0  ;;  %v2589_v30 = vmax.f32 %v2511_v45, 0.0  ;;  %v2244_v31 = vpop.permute.xlu0 %2243 }
 0x44d   : > { %v2587_v57 = vmax.f32 %v2398_v33, 0.0  ;;  %v2590_v28 = vmax.f32 %v2513_v10, 0.0 }
 0x44e   : > { %v2588_v39 = vmax.f32 %v2400_v47, 0.0  ;;  %v2648_v9 = vpack.c.bf16 %v2589_v30, %v2585_v14 }
 0x44f   : > { %v2646_v1 = vpack.c.bf16 %v2587_v57, %v2583_v54  ;;  %v2649_v11 = vpack.c.bf16 %v2590_v28, %v2586_v32  ;;  %v2516_v35 = vpop.f32.mrb[104].mxu1 }
 0x450   : > { %v2647_v60 = vpack.c.bf16 %v2588_v39, %v2584_v23  ;;  %v2403_v44 = vpop.f32.mrb[104].mxu0  ;;  %v2517_v61 = vadd.f32 %v2516_v35, %v2244_v31  ;;  %v2518_v33 = vpop.f32.mrb[105].mxu1 }
 0x451   : > { %v2404_v29 = vadd.f32 %v2403_v44, %v2244_v31  ;;  %v2405_v4 = vpop.f32.mrb[105].mxu0  ;;  %v2519_v15 = vadd.f32 %v2518_v33, %v2244_v31  ;;  %v2520_v42 = vpop.f32.mrb[106].mxu1  ;;  %2717 = vmatprep.subr.bf16.mxu1 %v2649_v11 }
 0x452   : > { %v2406_v8 = vadd.f32 %v2405_v4, %v2244_v31  ;;  %v2407_v58 = vpop.f32.mrb[106].mxu0  ;;  %2676 = vmatprep.subr.bf16.mxu0 %v2647_v60  ;;  %v2521_v41 = vadd.f32 %v2520_v42, %v2249_v12  ;;  %v2522_v47 = vpop.f32.mrb[107].mxu1  ;;  %2718 = vmatpush1.bf16.msra.mxu1 %v2648_v9  ;;  %v2593_v10 = vmax.f32 %v2517_v61, 0.0 }
 0x453   : > { %v2408_v36 = vadd.f32 %v2407_v58, %v2249_v12  ;;  %v2409_v43 = vpop.f32.mrb[107].mxu0  ;;  %2677 = vmatpush1.bf16.msra.mxu0 %v2646_v1  ;;  %v2591_v48 = vmax.f32 %v2404_v29, 0.0  ;;  %v2523_v57 = vadd.f32 %v2522_v47, %v2249_v12  ;;  %v2259_v39 = vpop.permute.xlu1 %2258  ;;  %v2594_v32 = vmax.f32 %v2519_v15, 0.0 }
 0x454   : > { %v2410_v45 = vadd.f32 %v2409_v43, %v2249_v12  ;;  %v2592_v14 = vmax.f32 %v2406_v8, 0.0  ;;  %v2597_v23 = vmax.f32 %v2521_v41, 0.0  ;;  %v2254_v60 = vpop.permute.xlu0 %2253 }
 0x455   : > { %v2595_v54 = vmax.f32 %v2408_v36, 0.0  ;;  %v2598_v31 = vmax.f32 %v2523_v57, 0.0 }
 0x456   : > { %v2596_v30 = vmax.f32 %v2410_v45, 0.0  ;;  %v2652_v44 = vpack.c.bf16 %v2597_v23, %v2593_v10 }
 0x457   : > { %v2650_v28 = vpack.c.bf16 %v2595_v54, %v2591_v48  ;;  %v2653_v1 = vpack.c.bf16 %v2598_v31, %v2594_v32  ;;  %v2526_v33 = vpop.f32.mrb[108].mxu1 }
 0x458   : > { %v2651_v11 = vpack.c.bf16 %v2596_v30, %v2592_v14  ;;  %v2413_v35 = vpop.f32.mrb[108].mxu0  ;;  %v2527_v9 = vadd.f32 %v2526_v33, %v2254_v60  ;;  %v2528_v36 = vpop.f32.mrb[109].mxu1 }
 0x459   : > { %v2414_v4 = vadd.f32 %v2413_v35, %v2254_v60  ;;  %v2415_v58 = vpop.f32.mrb[109].mxu0  ;;  %v2529_v61 = vadd.f32 %v2528_v36, %v2254_v60  ;;  %v2530_v42 = vpop.f32.mrb[110].mxu1  ;;  %2719 = vmatprep.subr.bf16.mxu1 %v2653_v1 }
 0x45a   : > { %v2416_v29 = vadd.f32 %v2415_v58, %v2254_v60  ;;  %v2417_v12 = vpop.f32.mrb[110].mxu0  ;;  %2678 = vmatprep.subr.bf16.mxu0 %v2651_v11  ;;  %v2531_v43 = vadd.f32 %v2530_v42, %v2259_v39  ;;  %v2532_v45 = vpop.f32.mrb[111].mxu1  ;;  %2720 = vmatpush1.bf16.msra.mxu1 %v2652_v44  ;;  %v2601_v57 = vmax.f32 %v2527_v9, 0.0 }
 0x45b   : > { %v2418_v8 = vadd.f32 %v2417_v12, %v2259_v39  ;;  %v2419_v15 = vpop.f32.mrb[111].mxu0  ;;  %2679 = vmatpush1.bf16.msra.mxu0 %v2650_v28  ;;  %v2599_v47 = vmax.f32 %v2414_v4, 0.0  ;;  %v2533_v54 = vadd.f32 %v2532_v45, %v2259_v39  ;;  %v2269_v30 = vpop.permute.xlu1 %2268  ;;  %v2602_v32 = vmax.f32 %v2529_v61, 0.0 }
 0x45c   : > { %v2420_v41 = vadd.f32 %v2419_v15, %v2259_v39  ;;  %v2600_v10 = vmax.f32 %v2416_v29, 0.0  ;;  %v2605_v14 = vmax.f32 %v2531_v43, 0.0  ;;  %v2264_v11 = vpop.permute.xlu0 %2263 }
 0x45d   : > { %v2603_v48 = vmax.f32 %v2418_v8, 0.0  ;;  %v2606_v60 = vmax.f32 %v2533_v54, 0.0 }
 0x45e   : > { %v2604_v23 = vmax.f32 %v2420_v41, 0.0  ;;  %v2656_v35 = vpack.c.bf16 %v2605_v14, %v2601_v57 }
 0x45f   : > { %v2654_v31 = vpack.c.bf16 %v2603_v48, %v2599_v47  ;;  %v2657_v28 = vpack.c.bf16 %v2606_v60, %v2602_v32  ;;  %v2536_v36 = vpop.f32.mrb[112].mxu1 }
 0x460   : > { %v2655_v1 = vpack.c.bf16 %v2604_v23, %v2600_v10  ;;  %v2423_v33 = vpop.f32.mrb[112].mxu0  ;;  %v2537_v44 = vadd.f32 %v2536_v36, %v2264_v11  ;;  %v2538_v8 = vpop.f32.mrb[113].mxu1 }
 0x461   : > { %v2424_v58 = vadd.f32 %v2423_v33, %v2264_v11  ;;  %v2425_v12 = vpop.f32.mrb[113].mxu0  ;;  %v2539_v9 = vadd.f32 %v2538_v8, %v2264_v11  ;;  %v2540_v42 = vpop.f32.mrb[114].mxu1  ;;  %2721 = vmatprep.subr.bf16.mxu1 %v2657_v28 }
 0x462   : > { %v2426_v4 = vadd.f32 %v2425_v12, %v2264_v11  ;;  %v2427_v39 = vpop.f32.mrb[114].mxu0  ;;  %2680 = vmatprep.subr.bf16.mxu0 %v2655_v1  ;;  %v2541_v15 = vadd.f32 %v2540_v42, %v2269_v30  ;;  %v2542_v41 = vpop.f32.mrb[115].mxu1  ;;  %2722 = vmatpush1.bf16.msra.mxu1 %v2656_v35  ;;  %v2609_v54 = vmax.f32 %v2537_v44, 0.0 }
 0x463   : > { %v2428_v29 = vadd.f32 %v2427_v39, %v2269_v30  ;;  %v2429_v61 = vpop.f32.mrb[115].mxu0  ;;  %2681 = vmatpush1.bf16.msra.mxu0 %v2654_v31  ;;  %v2607_v45 = vmax.f32 %v2424_v58, 0.0  ;;  %v2543_v48 = vadd.f32 %v2542_v41, %v2269_v30  ;;  %v2279_v23 = vpop.permute.xlu1 %2278  ;;  %v2610_v32 = vmax.f32 %v2539_v9, 0.0 }
 0x464   : > { %v2430_v43 = vadd.f32 %v2429_v61, %v2269_v30  ;;  %v2608_v57 = vmax.f32 %v2426_v4, 0.0  ;;  %v2613_v10 = vmax.f32 %v2541_v15, 0.0  ;;  %v2274_v1 = vpop.permute.xlu0 %2273 }
 0x465   : > { %v2611_v47 = vmax.f32 %v2428_v29, 0.0  ;;  %v2614_v11 = vmax.f32 %v2543_v48, 0.0 }
 0x466   : > { %v2612_v14 = vmax.f32 %v2430_v43, 0.0  ;;  %v2660_v33 = vpack.c.bf16 %v2613_v10, %v2609_v54 }
 0x467   : > { %v2658_v60 = vpack.c.bf16 %v2611_v47, %v2607_v45  ;;  %v2661_v31 = vpack.c.bf16 %v2614_v11, %v2610_v32  ;;  %v2546_v8 = vpop.f32.mrb[116].mxu1 }
 0x468   : > { %v2659_v28 = vpack.c.bf16 %v2612_v14, %v2608_v57  ;;  %v2433_v36 = vpop.f32.mrb[116].mxu0  ;;  %v2547_v35 = vadd.f32 %v2546_v8, %v2274_v1  ;;  %v2548_v29 = vpop.f32.mrb[117].mxu1 }
 0x469   : > { %v2434_v12 = vadd.f32 %v2433_v36, %v2274_v1  ;;  %v2435_v39 = vpop.f32.mrb[117].mxu0  ;;  %v2549_v44 = vadd.f32 %v2548_v29, %v2274_v1  ;;  %v2550_v42 = vpop.f32.mrb[118].mxu1  ;;  %2723 = vmatprep.subr.bf16.mxu1 %v2661_v31 }
 0x46a   : > { %v2436_v58 = vadd.f32 %v2435_v39, %v2274_v1  ;;  %v2437_v30 = vpop.f32.mrb[118].mxu0  ;;  %2682 = vmatprep.subr.bf16.mxu0 %v2659_v28  ;;  %v2551_v61 = vadd.f32 %v2550_v42, %v2279_v23  ;;  %v2552_v43 = vpop.f32.mrb[119].mxu1  ;;  %2724 = vmatpush1.bf16.msra.mxu1 %v2660_v33  ;;  %v2617_v48 = vmax.f32 %v2547_v35, 0.0 }
 0x46b   : > { %v2438_v4 = vadd.f32 %v2437_v30, %v2279_v23  ;;  %v2439_v9 = vpop.f32.mrb[119].mxu0  ;;  %2683 = vmatpush1.bf16.msra.mxu0 %v2658_v60  ;;  %v2615_v41 = vmax.f32 %v2434_v12, 0.0  ;;  %v2553_v47 = vadd.f32 %v2552_v43, %v2279_v23  ;;  %v2289_v14 = vpop.permute.xlu1 %2288  ;;  %v2618_v32 = vmax.f32 %v2549_v44, 0.0 }
 0x46c   : > { %v2440_v15 = vadd.f32 %v2439_v9, %v2279_v23  ;;  %v2616_v54 = vmax.f32 %v2436_v58, 0.0  ;;  %v2621_v57 = vmax.f32 %v2551_v61, 0.0  ;;  %v2284_v28 = vpop.permute.xlu0 %2283 }
 0x46d   : > { %v2619_v45 = vmax.f32 %v2438_v4, 0.0  ;;  %v2622_v1 = vmax.f32 %v2553_v47, 0.0 }
 0x46e   : > { %v2620_v10 = vmax.f32 %v2440_v15, 0.0  ;;  %v2664_v36 = vpack.c.bf16 %v2621_v57, %v2617_v48 }
 0x46f   : > { %v2662_v11 = vpack.c.bf16 %v2619_v45, %v2615_v41  ;;  %v2665_v60 = vpack.c.bf16 %v2622_v1, %v2618_v32  ;;  %v2556_v29 = vpop.f32.mrb[120].mxu1 }
 0x470   : > { %v2663_v31 = vpack.c.bf16 %v2620_v10, %v2616_v54  ;;  %v2443_v8 = vpop.f32.mrb[120].mxu0  ;;  %v2557_v33 = vadd.f32 %v2556_v29, %v2284_v28  ;;  %v2558_v4 = vpop.f32.mrb[121].mxu1 }
 0x471   : > { %v2444_v39 = vadd.f32 %v2443_v8, %v2284_v28  ;;  %v2445_v30 = vpop.f32.mrb[121].mxu0  ;;  %v2559_v35 = vadd.f32 %v2558_v4, %v2284_v28  ;;  %v2560_v42 = vpop.f32.mrb[122].mxu1  ;;  %2725 = vmatprep.subr.bf16.mxu1 %v2665_v60 }
 0x472   : > { %v2446_v12 = vadd.f32 %v2445_v30, %v2284_v28  ;;  %v2447_v23 = vpop.f32.mrb[122].mxu0  ;;  %2684 = vmatprep.subr.bf16.mxu0 %v2663_v31  ;;  %v2561_v9 = vadd.f32 %v2560_v42, %v2289_v14  ;;  %v2562_v15 = vpop.f32.mrb[123].mxu1  ;;  %2726 = vmatpush1.bf16.msra.mxu1 %v2664_v36  ;;  %v2625_v47 = vmax.f32 %v2557_v33, 0.0 }
 0x473   : > { %v2448_v58 = vadd.f32 %v2447_v23, %v2289_v14  ;;  %v2449_v44 = vpop.f32.mrb[123].mxu0  ;;  %2685 = vmatpush1.bf16.msra.mxu0 %v2662_v11  ;;  %v2623_v43 = vmax.f32 %v2444_v39, 0.0  ;;  %v2563_v45 = vadd.f32 %v2562_v15, %v2289_v14  ;;  %v2299_v10 = vpop.permute.xlu1 %2298  ;;  %v2626_v32 = vmax.f32 %v2559_v35, 0.0 }
 0x474   : > { %v2450_v61 = vadd.f32 %v2449_v44, %v2289_v14  ;;  %v2624_v48 = vmax.f32 %v2446_v12, 0.0  ;;  %v2629_v54 = vmax.f32 %v2561_v9, 0.0  ;;  %v2294_v31 = vpop.permute.xlu0 %2293 }
 0x475   : > { %v2627_v41 = vmax.f32 %v2448_v58, 0.0  ;;  %v2630_v28 = vmax.f32 %v2563_v45, 0.0 }
 0x476   : > { %v2628_v57 = vmax.f32 %v2450_v61, 0.0  ;;  %v2668_v8 = vpack.c.bf16 %v2629_v54, %v2625_v47 }
 0x477   : > { %v2666_v1 = vpack.c.bf16 %v2627_v41, %v2623_v43  ;;  %v2669_v11 = vpack.c.bf16 %v2630_v28, %v2626_v32  ;;  %v2566_v4 = vpop.f32.mrb[124].mxu1 }
 0x478   : > { %v2667_v60 = vpack.c.bf16 %v2628_v57, %v2624_v48  ;;  %v2453_v29 = vpop.f32.mrb[124].mxu0  ;;  %v2567_v36 = vadd.f32 %v2566_v4, %v2294_v31  ;;  %v2568_v58 = vpop.f32.mrb[125].mxu1 }
 0x479   : > { %v2454_v30 = vadd.f32 %v2453_v29, %v2294_v31  ;;  %v2455_v23 = vpop.f32.mrb[125].mxu0  ;;  %v2569_v33 = vadd.f32 %v2568_v58, %v2294_v31  ;;  %v2570_v42 = vpop.f32.mrb[126].mxu1  ;;  %2727 = vmatprep.subr.bf16.mxu1 %v2669_v11 }
 0x47a   : > { %v2456_v39 = vadd.f32 %v2455_v23, %v2294_v31  ;;  %v2457_v14 = vpop.f32.mrb[126].mxu0  ;;  %2686 = vmatprep.subr.bf16.mxu0 %v2667_v60  ;;  %v2571_v44 = vadd.f32 %v2570_v42, %v2299_v10  ;;  %v2572_v61 = vpop.f32.mrb[127].mxu1  ;;  %2728 = vmatpush1.bf16.msra.mxu1 %v2668_v8  ;;  %v2633_v45 = vmax.f32 %v2567_v36, 0.0 }
 0x47b   : > { %v2458_v12 = vadd.f32 %v2457_v14, %v2299_v10  ;;  %v2459_v35 = vpop.f32.mrb[127].mxu0  ;;  %2687 = vmatpush1.bf16.msra.mxu0 %v2666_v1  ;;  %v2631_v15 = vmax.f32 %v2454_v30, 0.0  ;;  %v2573_v41 = vadd.f32 %v2572_v61, %v2299_v10  ;;  %v2634_v57 = vmax.f32 %v2569_v33, 0.0  ;;  %v3146_v1 = vld [vmem:[%s4088_s5 + $0x2] sm:$0x3] }
 0x47c   : > { %v2460_v9 = vadd.f32 %v2459_v35, %v2299_v10  ;;  %v2632_v47 = vmax.f32 %v2456_v39, 0.0  ;;  %v2637_v48 = vmax.f32 %v2571_v44, 0.0  ;;  %v2848_v30 = vlaneseq }
 0x47d   : > { %v2635_v43 = vmax.f32 %v2458_v12, 0.0  ;;  %v2638_v28 = vmax.f32 %v2573_v41, 0.0 }
 0x47e   : > { %v2636_v54 = vmax.f32 %v2460_v9, 0.0  ;;  %v2672_v31 = vpack.c.bf16 %v2637_v48, %v2633_v45  ;;  %v2849_v36 = vshrl.u32 %v2848_v30, 7 }
 0x47f   : > { %v2670_v32 = vpack.c.bf16 %v2635_v43, %v2631_v15  ;;  %v2673_v29 = vpack.c.bf16 %v2638_v28, %v2634_v57 }
 0x480   : > { %v2671_v60 = vpack.c.bf16 %v2636_v54, %v2632_v47  ;;  %vm2850_vm2 = vcmp.eq.s32.totalorder %v2849_v36, 0 }
 0x481   : > { %2729 = vmatprep.subr.bf16.mxu1 %v2673_v29 }
 0x482   : > { %2688 = vmatprep.subr.bf16.mxu0 %v2671_v60  ;;  %2730 = vmatpush1.bf16.msra.mxu1 %v2672_v31 }
 0x483   : > { %2689 = vmatpush1.bf16.msra.mxu0 %v2670_v32  ;;  %2797 = vmatprep.subr.bf16.mxu1 %v3821_v55 }
 0x484   : > { %2756 = vmatprep.subr.bf16.mxu0 %v3819_v53 }
 0x485   : > { %2748 = vmatmul.mubr.bf16.vlgmr.msra.gmra.mrb[128].mxu1 %v3146_v1 }
 0x486   : > { %2707 = vmatmul.mubr.bf16.vlgmr.msra.gmra.mrb[128].mxu0 %v3146_v1  ;;  %2798 = vmatpush1.bf16.msra.mxu1 %v3817_v52 }
 0x487   : > { %2757 = vmatpush1.bf16.msra.mxu0 %v3815_v49  ;;  %2799 = vmatprep.subr.bf16.mxu1 %v3833_v22 }
 0x488   : > { %2758 = vmatprep.subr.bf16.mxu0 %v3831_v20  ;;  %2788 = vmatprep.mubr.bf16.mxu0 %v3421_v0 }
 0x489   : > { %2829 = vmatprep.mubr.bf16.mxu1 %v3421_v0  ;;  %v2639_v0 = vld [vmem:[%s4088_s5] sm:$0x3] }
 0x48a   : > { %2800 = vmatpush1.bf16.msra.mxu1 %v3829_v19 }
 0x48b   : > { %2759 = vmatpush1.bf16.msra.mxu0 %v3827_v16  ;;  %2801 = vmatprep.subr.bf16.mxu1 %v3845_v56 }
 0x48c   : > { %2760 = vmatprep.subr.bf16.mxu0 %v3843_v51 }
 0x48e   : > { %2802 = vmatpush1.bf16.msra.mxu1 %v3841_v50 }
 0x48f   : > { %2761 = vmatpush1.bf16.msra.mxu0 %v3839_v46  ;;  %2803 = vmatprep.subr.bf16.mxu1 %v3857_v27  ;;  %v2842_v46 = vpop.permute.xlu0 %2841 }
 0x490   : > { %2762 = vmatprep.subr.bf16.mxu0 %v3855_v25 }
 0x492   : > { %2804 = vmatpush1.bf16.msra.mxu1 %v3853_v24 }
 0x493   : > { %2763 = vmatpush1.bf16.msra.mxu0 %v3851_v18  ;;  %2805 = vmatprep.subr.bf16.mxu1 %v3869_v2 }
 0x494   : > { %2764 = vmatprep.subr.bf16.mxu0 %v3867_v63 }
 0x496   : > { %2806 = vmatpush1.bf16.msra.mxu1 %v3865_v62 }
 0x497   : > { %2765 = vmatpush1.bf16.msra.mxu0 %v3863_v59  ;;  %2807 = vmatprep.subr.bf16.mxu1 %v3881_v40 }
 0x498   : > { %2766 = vmatprep.subr.bf16.mxu0 %v3879_v38 }
 0x49a   : > { %2808 = vmatpush1.bf16.msra.mxu1 %v3877_v37 }
 0x49b   : > { %2767 = vmatpush1.bf16.msra.mxu0 %v3875_v34  ;;  %2809 = vmatprep.subr.bf16.mxu1 %v3893_v26 }
 0x49c   : > { %2768 = vmatprep.subr.bf16.mxu0 %v3891_v21 }
 0x49e   : > { %2810 = vmatpush1.bf16.msra.mxu1 %v3889_v17 }
 0x49f   : > { %2769 = vmatpush1.bf16.msra.mxu0 %v3887_v13  ;;  %2811 = vmatprep.subr.bf16.mxu1 %v3905_v7 }
 0x4a0   : > { %2770 = vmatprep.subr.bf16.mxu0 %v3903_v6 }
 0x4a2   : > { %2812 = vmatpush1.bf16.msra.mxu1 %v3901_v5 }
 0x4a3   : > { %2771 = vmatpush1.bf16.msra.mxu0 %v3899_v3 }
 0x4a5   : > { %2830 = vmatmul.mubr.bf16.vlgmr.msra.gmra.mrb[132].mxu1 %v2639_v0 }
 0x4a6   : > { %2789 = vmatmul.mubr.bf16.vlgmr.msra.gmra.mrb[132].mxu0 %v2639_v0 }
 0x558   : > { %v2749_v52 = vpop.f32.mrb[128].mxu1 }
 0x559   : > { %v2708_v49 = vpop.f32.mrb[128].mxu0  ;;  %v2751_v55 = vpop.f32.mrb[129].mxu1 }
 0x55a   : > { %v2710_v53 = vpop.f32.mrb[129].mxu0  ;;  %v2753_v19 = vpop.f32.mrb[130].mxu1 }
 0x55b   : > { %v2712_v16 = vpop.f32.mrb[130].mxu0  ;;  %v2754_v22 = vpop.f32.mrb[131].mxu1 }
 0x55c   : > { %v2713_v20 = vpop.f32.mrb[131].mxu0 }
 0x578   : > { %v2831_v56 = vpop.f32.mrb[132].mxu1 }
 0x579   : > { %v2790_v50 = vpop.f32.mrb[132].mxu0  ;;  %v2832_v24 = vadd.f32 %v2831_v56, %v2749_v52  ;;  %v2833_v27 = vpop.f32.mrb[133].mxu1 }
 0x57a   : > { %v2791_v51 = vadd.f32 %v2790_v50, %v2708_v49  ;;  %v2792_v18 = vpop.f32.mrb[133].mxu0  ;;  %v2834_v63 = vadd.f32 %v2833_v27, %v2751_v55  ;;  %v2835_v2 = vpop.f32.mrb[134].mxu1 }
 0x57b   : > { %v2793_v25 = vadd.f32 %v2792_v18, %v2710_v53  ;;  %v2794_v59 = vpop.f32.mrb[134].mxu0  ;;  %v2846_v37 = vadd.f32 %v2842_v46, %v2832_v24  ;;  %v2836_v40 = vpop.f32.mrb[135].mxu1 }
 0x57c   : > { %v2844_v62 = vadd.f32 %v2842_v46, %v2791_v51  ;;  %v2795_v34 = vpop.f32.mrb[135].mxu0  ;;  %v2847_v17 = vadd.f32 %v2842_v46, %v2834_v63 }
 0x57d   : > { %v2845_v38 = vadd.f32 %v2842_v46, %v2793_v25  ;;  %v3149_v21 = vmul.f32 -1.442695, %v2846_v37 }
 0x57e   : > { %v3147_v13 = vmul.f32 -1.442695, %v2844_v62  ;;  %v3150_v3 = vmul.f32 -1.442695, %v2847_v17 }
 0x57f   : > { %v3148_v26 = vmul.f32 -1.442695, %v2845_v38 }
 0x580   : > { %3325 = vpow2.f32 %v3147_v13 }
 0x581   : > { %3327 = vpow2.f32 %v3149_v21 }
 0x582   : > { %3329 = vpow2.f32 %v3148_v26 }
 0x583   : > { %3331 = vpow2.f32 %v3150_v3 }
 0x58a   : > { %v3326_v5 = vpop.eup %3325 }
 0x58b   : > { %v3328_v6 = vpop.eup %3327  ;;  %v2863_v7 = vadd.f32 1.0, %v3326_v5 }
 0x58c   : > { %v3330_v10 = vpop.eup %3329  ;;  %v2865_v8 = vadd.f32 1.0, %v3328_v6 }
 0x58d   : > { %v3332_v11 = vpop.eup %3331  ;;  %3333 = vrcp.f32 %v2863_v7  ;;  %v2864_v4 = vadd.f32 1.0, %v3330_v10 }
 0x58e   : > { %3335 = vrcp.f32 %v2865_v8  ;;  %v2866_v23 = vadd.f32 1.0, %v3332_v11 }
 0x58f   : > { %3337 = vrcp.f32 %v2864_v4 }
 0x590   : > { %3339 = vrcp.f32 %v2866_v23 }
 0x597   : > { %v3334_v39 = vpop.eup %3333 }
 0x598   : > { %v3336_v58 = vpop.eup %3335  ;;  %v2875_v14 = vsel %vm2850_vm2, %v2844_v62, %v3334_v39 }
 0x599   : > { %v3338_v33 = vpop.eup %3337  ;;  %v2877_v12 = vsel %vm2850_vm2, %v2846_v37, %v3336_v58 }
 0x59a   : > { %v3340_v42 = vpop.eup %3339  ;;  %v2876_v35 = vsel %vm2850_vm2, %v2845_v38, %v3338_v33 }
 0x59b   : > { %v2878_v44 = vsel %vm2850_vm2, %v2847_v17, %v3340_v42  ;;  %v2883_v9 = vcombine.low %v2875_v14, %v2876_v35 }
 0x59c   : > { %v2884_v61 = vcombine.low %v2877_v12, %v2878_v44 }
 0x59d   : > { %2887 = vst [vmem:[%s311_s8] sm:$0xff] %v2883_v9 }
 0x59e   : > { %2888 = vst [vmem:[%s311_s8 + $0x8] sm:$0xff] %v2884_v61 }
 0x59f   : > { %3354 = shalt.err (!%p3351_p5)
}
 0x5a0   : > { %s3355_s21 = scalar_lea.hbm %s4036_s16, 256  ;;  %s3359_s30 = scalar_lea.hbm %s4090_s7, 512 }
 0x5a1   : > { %p3356_p6 = scmp.ne.s32.totalorder %s4036_s16, %s3355_s21  ;;  %p3360_p10 = scmp.lt.u32.totalorder %s4036_s16, %s4090_s7 }
 0x5a2   : > { %p3361_p11 = scmp.lt.u32.totalorder %s3359_s30, %s3355_s21  ;;  %p3363_p13 = scmp.lt.u32.totalorder %s3355_s21, %s4036_s16 }
 0x5a3   : > { %p3357_p7 = pnand %p3356_p6, %p3503_p4 }
 0x5a4   : > { %p3362_p12 = por %p3361_p11, %p3360_p10 }
 0x5a5   : > { %p3358_p9 = pneg %p3357_p7 }
 0x5a6   : > { %p3364_p0 = por %p3363_p13, %p3362_p12 }
 0x5a8   : > { %p3365_p1 = pnand %p3364_p0, %p3358_p9 }
 0x5aa   : > { %3368 = shalt.err (!%p3365_p1)
}
 0x5ab   : > { %3223 = dma.vmem_to_hbm [thread:$0]  (%p3503_p4), %s4038_s10, 256, %s4036_s16, %s2890_s27  }
 0x5ac PF: > { %p3229_p2 = scmp.ge.s32.totalorder %s3419_s29, 2  ;;  %s2918_s15 = sand.u32 1, %s3399_s24  }
 0x5ad   : > { %s2919_s17 = scalar_lea.sflag [#allocation3], %s2918_s15 }
 0x5ae   : > { %p3226_p3 = pnand %p3229_p2, %p3510_p8 }
 0x5b0   : > { %3394 = dma.done.wait (!%p3226_p3), %s2919_s17, 256  }
 0x5b1   : > { %3396 = vsyncadd (!%p3226_p3), %s2919_s17, 4294967040  ;;  %s20_s29 = sadd.s32 1, %s3419_s29   ;;  %s4093_s24 = smov %s3403_s25 }
 0x5b2   : > { %p17_p5 = scmp.ge.s32.totalorder %s20_s29, 4   ;;  %s4094_s25 = smov %s3407_s26 }
 0x5b3   : > { %s4095_s26 = smov %s3516_s14  ;;  %s4096_s27 = smov %s3415_s28 }
 0x5b4   : > { %s4097_s28 = smov %s4099_s9  ;;  %19 = sbr.rel (!%p17_p5) target bundleno = 4 (0x4), region = 91 }
 0x5bb   :  { %2924 = vsyncpa [#allocation3], 1 }
 0x5bc   :  { %2926 = vsyncpa [#allocation3 + $0x1], 1 }

</bundles_post_ra>
